<compile_context>
chip_gen: v7x
topology: tpu7x:2x2x1
jax: 0.10.0
libtpu: 0.0.40
codegen_flags: <defaults>
</compile_context>

<pallas_src>
import functools

import jax
import jax.numpy as jnp
from jax.experimental import pallas as pl
from jax.experimental.pallas import tpu as pltpu

NEG_SLOPE = 0.1            # nn.LeakyReLU(0.1)
BN_EPS = 1e-5              # nn.BatchNorm2d default eps
VMEM_LIMIT = 32 * 1024 * 1024
TM_CAP, TN_CAP, TK_CAP = 256, 512, 1024


# ------------------------------ small helpers ------------------------------ #

def _round_up(x, m):
    return (x + m - 1) // m * m


def _pick_n_tile(n, cap=TN_CAP):
    if n <= cap:
        return n
    t = cap
    while t >= 128:
        if n % t == 0:
            return t
        t -= 128
    return cap


def _pick_k_tile(k, cap=TK_CAP):
    kr = _round_up(k, 128)
    if kr <= cap:
        return kr
    t = cap
    while t >= 128:
        if kr % t == 0:
            return t
        t -= 128
    return cap


def _pick_cout_tile(kk_cin, coutp, ohow, budget=6 << 20):
    """Largest 128-multiple divisor of coutp whose weight+out+acc block fits budget."""
    tn = coutp
    while tn >= 128:
        if coutp % tn == 0 and kk_cin * tn * 2 + ohow * tn * 6 <= budget:
            return tn
        tn -= 128
    return None


# --------------------------- direct conv kernel ----------------------------- #
# One grid step = one image x one cout tile.  Reads the (pre-padded) input once,
# optionally applies the *previous* layer's BN scale/shift + LeakyReLU on load
# (re-zeroing the spatial border so zero padding stays exact), then runs k*k MXU
# matmuls over shifted windows held in VMEM.  Also emits per-image per-channel
# sum / sum-of-squares of the f32 accumulator for this layer's BatchNorm.

def _direct_conv_kernel(*refs, ksz, pad, oh, ow, fuse_in, mask_border):
    x_ref, w_ref = refs[0], refs[1]
    if fuse_in:
        sc_ref, sh_ref = refs[2], refs[3]
        o_ref, s_ref, q_ref = refs[4], refs[5], refs[6]
    else:
        o_ref, s_ref, q_ref = refs[2], refs[3], refs[4]

    x = x_ref[0]                                        # (HP, WP, Cin_p) bf16
    hp, wp, cinp = x.shape
    if fuse_in:
        xf = x.astype(jnp.float32) * sc_ref[...] + sh_ref[...]
        xf = jnp.where(xf >= 0, xf, NEG_SLOPE * xf)
        if mask_border:
            r = jax.lax.broadcasted_iota(jnp.int32, xf.shape, 0)
            c = jax.lax.broadcasted_iota(jnp.int32, xf.shape, 1)
            inside = ((r >= pad) & (r < hp - pad) &
                      (c >= pad) & (c < wp - pad))
            xf = jnp.where(inside, xf, 0.0)             # padding must stay zero
        x = xf.astype(jnp.bfloat16)

    tn = o_ref.shape[-1]
    acc = jnp.zeros((oh * ow, tn), jnp.float32)
    for kh in range(ksz):
        for kw in range(ksz):
            patch = x[kh:kh + oh, kw:kw + ow, :].reshape(oh * ow, cinp)
            wsl = w_ref[(kh * ksz + kw) * cinp:(kh * ksz + kw + 1) * cinp, :]
            acc = acc + jnp.dot(patch, wsl, preferred_element_type=jnp.float32)

    o_ref[0] = acc.astype(o_ref.dtype)
    s_ref[0] = jnp.sum(acc, axis=0, keepdims=True)
    q_ref[0] = jnp.sum(acc * acc, axis=0, keepdims=True)


def pallas_direct_conv(xp, wmat, ksz, pad, oh, ow, tn, pending):
    """xp: (N, HP, WP, Cin_p) bf16 (already spatially padded).  Returns raw conv output
    (N, OH, OW, Cout_p) bf16 plus per-image per-channel sum / sumsq (N, 1, Cout_p)."""
    N, HP, WP, Cinp = xp.shape
    KK, Coutp = wmat.shape
    fuse_in = pending is not None
    mask_border = fuse_in and pad > 0
    gj = Coutp // tn

    in_specs = [pl.BlockSpec((1, HP, WP, Cinp), lambda n, j: (n, 0, 0, 0)),
                pl.BlockSpec((KK, tn), lambda n, j: (0, j))]
    inputs = [xp, wmat]
    if fuse_in:
        sc, sh = pending
        in_specs += [pl.BlockSpec((1, Cinp), lambda n, j: (0, 0)),
                     pl.BlockSpec((1, Cinp), lambda n, j: (0, 0))]
        inputs += [sc, sh]

    out_shape = (jax.ShapeDtypeStruct((N, oh * ow, Coutp), jnp.bfloat16),
                 jax.ShapeDtypeStruct((N, 1, Coutp), jnp.float32),
                 jax.ShapeDtypeStruct((N, 1, Coutp), jnp.float32))
    out_specs = (pl.BlockSpec((1, oh * ow, tn), lambda n, j: (n, 0, j)),
                 pl.BlockSpec((1, 1, tn), lambda n, j: (n, 0, j)),
                 pl.BlockSpec((1, 1, tn), lambda n, j: (n, 0, j)))

    kern = functools.partial(_direct_conv_kernel, ksz=ksz, pad=pad, oh=oh, ow=ow,
                             fuse_in=fuse_in, mask_border=mask_border)
    y, s, q = pl.pallas_call(
        kern, out_shape=out_shape, grid=(N, gj),
        in_specs=in_specs, out_specs=out_specs,
        compiler_params=pltpu.CompilerParams(
            dimension_semantics=("parallel", "parallel"),
            vmem_limit_bytes=VMEM_LIMIT),
    )(*inputs)
    return y.reshape(N, oh, ow, Coutp), s, q


# --------------------------- tiled MXU matmul (FC) --------------------------- #

def _mm_kernel(a_ref, b_ref, *rest, has_bias, activation):
    if has_bias:
        bias_ref, o_ref, acc_ref = rest
    else:
        o_ref, acc_ref = rest
        bias_ref = None

    k = pl.program_id(2)

    @pl.when(k == 0)
    def _():
        acc_ref[...] = jnp.zeros_like(acc_ref)

    acc_ref[...] += jnp.dot(a_ref[...], b_ref[...],
                            preferred_element_type=jnp.float32)

    @pl.when(k == pl.num_programs(2) - 1)
    def _():
        r = acc_ref[...]
        if has_bias:
            r = r + bias_ref[...]
        if activation == "leaky":
            r = jnp.where(r >= 0, r, NEG_SLOPE * r)
        o_ref[...] = r.astype(o_ref.dtype)


def pallas_matmul(a, b, bias=None, activation="none", out_dtype=jnp.float32):
    """out = act(a @ b + bias); bf16 MXU operands, f32 VMEM accumulator, padded tiles."""
    M, K = a.shape
    Kb, Np = b.shape
    assert K == Kb, (a.shape, b.shape)
    assert Np % 128 == 0, "weights must be pre-packed lane dense"
    a = a.astype(jnp.bfloat16)
    b = b.astype(jnp.bfloat16)
    has_bias = bias is not None

    tm = min(TM_CAP, _round_up(M, 8))
    Mp = _round_up(M, tm)
    tk = _pick_k_tile(K)
    Kp = _round_up(K, tk)
    tn = _pick_n_tile(Np)
    Npp = _round_up(Np, tn)

    if Mp != M or Kp != K:
        a = jnp.pad(a, ((0, Mp - M), (0, Kp - K)))
    if Kp != K or Npp != Np:
        b = jnp.pad(b, ((0, Kp - K), (0, Npp - Np)))

    in_specs = [pl.BlockSpec((tm, tk), lambda i, j, k: (i, k)),
                pl.BlockSpec((tk, tn), lambda i, j, k: (k, j))]
    inputs = [a, b]
    if has_bias:
        bvec = jnp.pad(bias.astype(jnp.float32), (0, Npp - bias.shape[0]))
        in_specs.append(pl.BlockSpec((1, tn), lambda i, j, k: (0, j)))
        inputs.append(bvec.reshape(1, Npp))

    out = pl.pallas_call(
        functools.partial(_mm_kernel, has_bias=has_bias, activation=activation),
        out_shape=jax.ShapeDtypeStruct((Mp, Npp), out_dtype),
        grid=(Mp // tm, Npp // tn, Kp // tk),
        in_specs=in_specs,
        out_specs=pl.BlockSpec((tm, tn), lambda i, j, k: (i, j)),
        scratch_shapes=[pltpu.VMEM((tm, tn), jnp.float32)],
        compiler_params=pltpu.CompilerParams(
            dimension_semantics=("parallel", "parallel", "arbitrary"),
            vmem_limit_bytes=VMEM_LIMIT),
    )(*inputs)
    return out[:M, :Np]


# -------------------- 2x2 max pool (with optional fused BN+leaky) ------------ #

def _maxpool_kernel(*refs, fuse_act):
    if fuse_act:
        x_ref, sc_ref, sh_ref, o_ref = refs
    else:
        x_ref, o_ref = refs
    x = x_ref[...]                                    # (tr, 2, OW, 2, C)
    if fuse_act:
        xf = x.astype(jnp.float32) * sc_ref[...] + sh_ref[...]
        x = jnp.where(xf >= 0, xf, NEG_SLOPE * xf)
    m = jnp.max(x, axis=3)                            # (tr, 2, OW, C)
    m = jnp.max(m, axis=1)                            # (tr, OW, C)
    o_ref[...] = m.astype(o_ref.dtype)


def pallas_maxpool2x2(x, pending=None):
    """nn.MaxPool2d(2,2) on NHWC (lane-padded C); optionally applies the previous
    conv's BatchNorm scale/shift + LeakyReLU before pooling (fused, one HBM read)."""
    N, H, W, C = x.shape
    OH, OW = H // 2, W // 2
    if H != 2 * OH or W != 2 * OW:                    # torch floors odd spatial dims
        x = x[:, :2 * OH, :2 * OW, :]
    rows = N * OH
    x5 = x.reshape(rows, 2, OW, 2, C)                 # free row-major reshape
    fuse_act = pending is not None

    bytes_per_row = 2 * OW * 2 * C * x5.dtype.itemsize
    tr = max(1, min(rows, (8 << 20) // max(1, bytes_per_row)))
    rows_p = _round_up(rows, tr)
    if rows_p != rows:
        x5 = jnp.pad(x5, ((0, rows_p - rows), (0, 0), (0, 0), (0, 0), (0, 0)))

    in_specs = [pl.BlockSpec((tr, 2, OW, 2, C), lambda i: (i, 0, 0, 0, 0))]
    inputs = [x5]
    if fuse_act:
        sc, sh = pending
        in_specs += [pl.BlockSpec((1, C), lambda i: (0, 0)),
                     pl.BlockSpec((1, C), lambda i: (0, 0))]
        inputs += [sc, sh]

    out = pl.pallas_call(
        functools.partial(_maxpool_kernel, fuse_act=fuse_act),
        out_shape=jax.ShapeDtypeStruct((rows_p, OW, C), jnp.bfloat16),
        grid=(rows_p // tr,),
        in_specs=in_specs,
        out_specs=pl.BlockSpec((tr, OW, C), lambda i: (i, 0, 0)),
        compiler_params=pltpu.CompilerParams(
            dimension_semantics=("parallel",), vmem_limit_bytes=VMEM_LIMIT),
    )(*inputs)
    return out[:rows].reshape(N, OH, OW, C)


# --------------- standalone BN apply + LeakyReLU (fallback only) ------------- #

def _bn_act_kernel(x_ref, sc_ref, sh_ref, o_ref):
    y = x_ref[...].astype(jnp.float32) * sc_ref[...] + sh_ref[...]
    o_ref[...] = jnp.where(y >= 0, y, NEG_SLOPE * y).astype(o_ref.dtype)


def apply_bn_leaky(x_nhwc, pending):
    sc, sh = pending
    N, H, W, C = x_nhwc.shape
    M = N * H * W
    x2 = x_nhwc.reshape(M, C)
    tr = min(512, _round_up(M, 8))
    Mp = _round_up(M, tr)
    if Mp != M:
        x2 = jnp.pad(x2, ((0, Mp - M), (0, 0)))
    out = pl.pallas_call(
        _bn_act_kernel,
        out_shape=jax.ShapeDtypeStruct((Mp, C), jnp.bfloat16),
        grid=(Mp // tr,),
        in_specs=[pl.BlockSpec((tr, C), lambda i: (i, 0)),
                  pl.BlockSpec((1, C), lambda i: (0, 0)),
                  pl.BlockSpec((1, C), lambda i: (0, 0))],
        out_specs=pl.BlockSpec((tr, C), lambda i: (i, 0)),
        compiler_params=pltpu.CompilerParams(
            dimension_semantics=("parallel",), vmem_limit_bytes=VMEM_LIMIT),
    )(x2, sc, sh)
    return out[:M].reshape(N, H, W, C)


# -------------------------------- JAX glue ---------------------------------- #

def im2col(x_nhwc, k, stride, pad):
    """Fallback patch builder (only used for strided / oversized convs)."""
    N, H, W, C = x_nhwc.shape
    if k == 1 and stride == 1 and pad == 0:
        return x_nhwc.reshape(N * H * W, C), (N, H, W)
    xp = jnp.pad(x_nhwc, ((0, 0), (pad, pad), (pad, pad), (0, 0)))
    OH = (H + 2 * pad - k) // stride + 1
    OW = (W + 2 * pad - k) // stride + 1
    cols = []
    for i in range(k):
        for j in range(k):
            cols.append(xp[:, i:i + stride * OH:stride, j:j + stride * OW:stride, :])
    patches = jnp.concatenate(cols, axis=-1)
    return patches.reshape(N * OH * OW, k * k * C), (N, OH, OW)


def conv_block(x, layer, pending):
    """Conv2d(bias=False) raw output + BN batch stats; BN+leaky of the *previous* layer
    is applied inside this conv's kernel (pending).  Returns (raw output, new pending)."""
    ksz, stride, pad = layer["k"], layer["stride"], layer["pad"]
    cout, coutp, cinp = layer["cout"], layer["coutp"], layer["cinp"]
    N, H, W, Cp = x.shape
    assert Cp == cinp, (Cp, cinp)
    OH = (H + 2 * pad - ksz) // stride + 1
    OW = (W + 2 * pad - ksz) // stride + 1

    tn = None
    if stride == 1 and (H + 2 * pad) * (W + 2 * pad) * cinp * 6 <= (8 << 20):
        tn = _pick_cout_tile(ksz * ksz * cinp, coutp, OH * OW)

    if tn is not None:
        xin = x
        if pad > 0:
            xin = jnp.pad(x, ((0, 0), (pad, pad), (pad, pad), (0, 0)))
        y, psum, psq = pallas_direct_conv(xin, layer["wmat"], ksz, pad, OH, OW, tn, pending)
        ch_sum = jnp.sum(psum, axis=(0, 1))
        ch_sq = jnp.sum(psq, axis=(0, 1))
    else:
        # TODO(synk): spatially-tiled direct conv for large/strided layers; im2col fallback.
        xin = x if pending is None else apply_bn_leaky(x, pending)
        patches, _ = im2col(xin, ksz, stride, pad)
        y2 = pallas_matmul(patches, layer["wmat"], out_dtype=jnp.bfloat16)
        yf = y2.astype(jnp.float32)
        ch_sum = jnp.sum(yf, axis=0)
        ch_sq = jnp.sum(yf * yf, axis=0)
        y = y2.reshape(N, OH, OW, coutp)

    count = N * OH * OW
    mean = ch_sum[:cout] / count
    var = jnp.maximum(ch_sq[:cout] / count - mean * mean, 0.0)   # biased (torch forward)
    scale = layer["gamma"] * jax.lax.rsqrt(var + BN_EPS)
    shift = layer["beta"] - mean * scale
    scale_p = jnp.pad(scale, (0, coutp - cout)).reshape(1, coutp).astype(jnp.float32)
    shift_p = jnp.pad(shift, (0, coutp - cout)).reshape(1, coutp).astype(jnp.float32)
    return y, (scale_p, shift_p)


def init_yolov1_params(key, arch, in_channels, grids, num_boxes, num_classes):
    layers = []
    c = in_channels

    def make_conv(k_, cin, cout, ksz, stride, pad):
        cinp, coutp = _round_up(cin, 128), _round_up(cout, 128)
        w = 0.05 * jax.random.normal(k_, (cout, cin, ksz, ksz), jnp.float32)
        wk = jnp.transpose(w, (2, 3, 1, 0))                      # (kh, kw, cin, cout)
        wk = jnp.pad(wk, ((0, 0), (0, 0), (0, cinp - cin), (0, coutp - cout)))
        wmat = wk.reshape(ksz * ksz * cinp, coutp).astype(jnp.bfloat16)
        return {"type": "conv", "wmat": wmat, "cout": cout, "coutp": coutp,
                "cin": cin, "cinp": cinp,
                "gamma": jnp.ones((cout,), jnp.float32),          # BN default weight=1
                "beta": jnp.zeros((cout,), jnp.float32),          # BN default bias=0
                "k": ksz, "stride": stride, "pad": pad}

    for item in arch:
        if isinstance(item, tuple):
            key, sub = jax.random.split(key)
            layers.append(make_conv(sub, c, item[1], item[0], item[2], item[3]))
            c = item[1]
        elif isinstance(item, str):
            layers.append({"type": "maxpool"})
        elif isinstance(item, list):
            for _ in range(item[2]):
                key, s1, s2 = jax.random.split(key, 3)
                layers.append(make_conv(s1, c, item[0][1], item[0][0], item[0][2], item[0][3]))
                layers.append(make_conv(s2, item[0][1], item[1][1], item[1][0], item[1][2], item[1][3]))
                c = item[1][1]

    S = grids
    c_last = c
    cp_last = _round_up(c_last, 128)
    out_dim = S * S * (num_boxes * 5 + num_classes)
    hidden, hidden_p = 496, _round_up(496, 128)                  # 496 -> 512 lane dense
    out_p = _round_up(out_dim, 128)

    key, k1, k2, k3, k4 = jax.random.split(key, 5)
    w1 = 0.02 * jax.random.normal(k1, (hidden, c_last * S * S), jnp.float32)
    b1 = 0.02 * jax.random.normal(k2, (hidden,), jnp.float32)
    w2 = 0.02 * jax.random.normal(k3, (out_dim, hidden), jnp.float32)
    b2 = 0.02 * jax.random.normal(k4, (out_dim,), jnp.float32)

    # Permute fc1 weight rows from torch's NCHW flatten order to our NHWC (lane-padded)
    # flatten order once at init -> no per-forward transpose of the feature map.
    w1r = w1.reshape(hidden, c_last, S, S)                        # (hid, c, h, w)
    w1n = jnp.transpose(w1r, (2, 3, 1, 0))                        # (h, w, c, hid)
    w1n = jnp.pad(w1n, ((0, 0), (0, 0), (0, cp_last - c_last), (0, hidden_p - hidden)))
    fc = {
        "w1m": w1n.reshape(S * S * cp_last, hidden_p).astype(jnp.bfloat16),
        "b1p": jnp.pad(b1, (0, hidden_p - hidden)).astype(jnp.float32),
        "w2m": jnp.pad(w2.T, ((0, hidden_p - hidden), (0, out_p - out_dim))).astype(jnp.bfloat16),
        "b2p": jnp.pad(b2, (0, out_p - out_dim)).astype(jnp.float32),
        "out_dim": out_dim,
    }
    return {"darknet": layers, "fc": fc}


def yolov1_forward(params, x_nchw):
    x = jnp.transpose(x_nchw, (0, 2, 3, 1))                       # NCHW -> NHWC
    c0 = x.shape[-1]
    c0p = _round_up(c0, 128)
    if c0p != c0:
        x = jnp.pad(x, ((0, 0), (0, 0), (0, 0), (0, c0p - c0)))   # lane-pad channels once
    x = x.astype(jnp.bfloat16)

    pending = None            # (scale, shift) of the last conv, applied by its consumer
    for layer in params["darknet"]:
        if layer["type"] == "conv":
            x, pending = conv_block(x, layer, pending)
        else:
            x = pallas_maxpool2x2(x, pending)                     # BN+leaky fused here
            pending = None
    if pending is not None:
        x = apply_bn_leaky(x, pending)
        pending = None

    fc = params["fc"]
    flat = x.reshape(x.shape[0], -1)                              # NHWC flatten, no transpose
    # Linear -> Dropout(0.0) (identity) -> LeakyReLU(0.1) -> Linear.  Padded hidden lanes
    # stay 0 and matching padded rows of w2m are 0, so semantics are exact.
    h = pallas_matmul(flat, fc["w1m"], fc["b1p"], activation="leaky",
                      out_dtype=jnp.bfloat16)
    out = pallas_matmul(h, fc["w2m"], fc["b2p"], activation="none",
                        out_dtype=jnp.float32)
    return out[:, :fc["out_dim"]]


# ---------------------------------- main ------------------------------------ #

if __name__ == "__main__":
    GRIDS, NUM_BOXES, NUM_CLASSES = 2, 2, 4
    IN_CHANNELS = 3
    # Small architecture exercising all three config element types
    # (tuple conv, "M" maxpool, repeated [conv, conv, n] block).
    # Ends with 1024 channels at GRIDS x GRIDS spatial so the hardcoded
    # 1024 * S * S FC input of the reference model matches.
    arch = [
        (3, 16, 1, 1),                        # 3 -> 16, 8x8
        "M",                                  # 8x8 -> 4x4
        [(1, 32, 1, 0), (3, 1024, 1, 1), 1],  # 16 -> 32 (1x1), 32 -> 1024 (3x3)
        "M",                                  # 4x4 -> 2x2  (= GRIDS)
    ]

    key = jax.random.PRNGKey(0)
    key, pk, xk = jax.random.split(key, 3)
    params = init_yolov1_params(pk, arch, IN_CHANNELS, GRIDS, NUM_BOXES, NUM_CLASSES)

    x = jax.random.normal(xk, (2, IN_CHANNELS, 8, 8), jnp.float32)   # NCHW, like torch
    out = yolov1_forward(params, x)
    out = jax.block_until_ready(out)

    expected_shape = (2, GRIDS * GRIDS * (NUM_BOXES * 5 + NUM_CLASSES))
    assert out.shape == expected_shape, (out.shape, expected_shape)
    assert bool(jnp.all(jnp.isfinite(out)))
    print("KERNEL_OK")
</pallas_src>

<mosaic_0001>
module attributes {stable_mosaic.version = 11 : i64} {
  func.func @_direct_conv_kernel(%arg0: i32, %arg1: i32, %arg2: memref<1x10x10x128xbf16, #tpu.memory_space<vmem>>, %arg3: memref<1152x128xbf16, #tpu.memory_space<vmem>>, %arg4: memref<1x64x128xbf16, #tpu.memory_space<vmem>>, %arg5: memref<1x1x128xf32, #tpu.memory_space<vmem>>, %arg6: memref<1x1x128xf32, #tpu.memory_space<vmem>>) attributes {dimension_semantics = [#tpu.dimension_semantics<parallel>, #tpu.dimension_semantics<parallel>], iteration_bounds = array<i64: 2, 1>, scalar_prefetch = 0 : i64, scratch_operands = 0 : i64, tpu.core_type = #tpu.core_type<tc>, window_params = [{transform_indices = @transform_0, window_bounds = array<i64: 1, 10, 10, 128>}, {transform_indices = @transform_1, window_bounds = array<i64: 1152, 128>}, {transform_indices = @transform_2, window_bounds = array<i64: 1, 64, 128>}, {transform_indices = @transform_3, window_bounds = array<i64: 1, 1, 128>}, {transform_indices = @transform_4, window_bounds = array<i64: 1, 1, 128>}]} {
    %c0 = arith.constant 0 : index
    %c0_0 = arith.constant 0 : index
    %c0_1 = arith.constant 0 : index
    %c0_2 = arith.constant 0 : index
    %0 = vector.load %arg2[%c0, %c0_0, %c0_1, %c0_2] : memref<1x10x10x128xbf16, #tpu.memory_space<vmem>>, vector<1x10x10x128xbf16>
    %1 = vector.shape_cast %0 : vector<1x10x10x128xbf16> to vector<10x10x128xbf16>
    %cst = arith.constant 0.000000e+00 : f32
    %2 = vector.broadcast %cst : f32 to vector<64x128xf32>
    %3 = vector.extract_strided_slice %1 {offsets = [0, 0, 0], sizes = [8, 8, 128], strides = [1, 1, 1]} : vector<10x10x128xbf16> to vector<8x8x128xbf16>
    %4 = vector.shape_cast %3 : vector<8x8x128xbf16> to vector<64x128xbf16>
    %c0_3 = arith.constant 0 : index
    %c0_4 = arith.constant 0 : index
    %5 = vector.load %arg3[%c0_3, %c0_4] : memref<1152x128xbf16, #tpu.memory_space<vmem>>, vector<128x128xbf16>
    %cst_5 = arith.constant dense<0.000000e+00> : vector<64x128xf32>
    %6 = tpu.matmul %4, %5, %cst_5 {dimension_numbers = #tpu.dot_dimension_numbers<[1], [0], [0], [1], [0, 0, 1, 1], [], []>} : vector<64x128xbf16>, vector<128x128xbf16>, vector<64x128xf32> -> vector<64x128xf32>
    %7 = arith.addf %2, %6 : vector<64x128xf32>
    %8 = vector.extract_strided_slice %1 {offsets = [0, 1, 0], sizes = [8, 8, 128], strides = [1, 1, 1]} : vector<10x10x128xbf16> to vector<8x8x128xbf16>
    %9 = vector.shape_cast %8 : vector<8x8x128xbf16> to vector<64x128xbf16>
    %c128 = arith.constant 128 : index
    %c0_6 = arith.constant 0 : index
    %10 = vector.load %arg3[%c128, %c0_6] : memref<1152x128xbf16, #tpu.memory_space<vmem>>, vector<128x128xbf16>
    %cst_7 = arith.constant dense<0.000000e+00> : vector<64x128xf32>
    %11 = tpu.matmul %9, %10, %cst_7 {dimension_numbers = #tpu.dot_dimension_numbers<[1], [0], [0], [1], [0, 0, 1, 1], [], []>} : vector<64x128xbf16>, vector<128x128xbf16>, vector<64x128xf32> -> vector<64x128xf32>
    %12 = arith.addf %7, %11 : vector<64x128xf32>
    %13 = vector.extract_strided_slice %1 {offsets = [0, 2, 0], sizes = [8, 8, 128], strides = [1, 1, 1]} : vector<10x10x128xbf16> to vector<8x8x128xbf16>
    %14 = vector.shape_cast %13 : vector<8x8x128xbf16> to vector<64x128xbf16>
    %c256 = arith.constant 256 : index
    %c0_8 = arith.constant 0 : index
    %15 = vector.load %arg3[%c256, %c0_8] : memref<1152x128xbf16, #tpu.memory_space<vmem>>, vector<128x128xbf16>
    %cst_9 = arith.constant dense<0.000000e+00> : vector<64x128xf32>
    %16 = tpu.matmul %14, %15, %cst_9 {dimension_numbers = #tpu.dot_dimension_numbers<[1], [0], [0], [1], [0, 0, 1, 1], [], []>} : vector<64x128xbf16>, vector<128x128xbf16>, vector<64x128xf32> -> vector<64x128xf32>
    %17 = arith.addf %12, %16 : vector<64x128xf32>
    %18 = vector.extract_strided_slice %1 {offsets = [1, 0, 0], sizes = [8, 8, 128], strides = [1, 1, 1]} : vector<10x10x128xbf16> to vector<8x8x128xbf16>
    %19 = vector.shape_cast %18 : vector<8x8x128xbf16> to vector<64x128xbf16>
    %c384 = arith.constant 384 : index
    %c0_10 = arith.constant 0 : index
    %20 = vector.load %arg3[%c384, %c0_10] : memref<1152x128xbf16, #tpu.memory_space<vmem>>, vector<128x128xbf16>
    %cst_11 = arith.constant dense<0.000000e+00> : vector<64x128xf32>
    %21 = tpu.matmul %19, %20, %cst_11 {dimension_numbers = #tpu.dot_dimension_numbers<[1], [0], [0], [1], [0, 0, 1, 1], [], []>} : vector<64x128xbf16>, vector<128x128xbf16>, vector<64x128xf32> -> vector<64x128xf32>
    %22 = arith.addf %17, %21 : vector<64x128xf32>
    %23 = vector.extract_strided_slice %1 {offsets = [1, 1, 0], sizes = [8, 8, 128], strides = [1, 1, 1]} : vector<10x10x128xbf16> to vector<8x8x128xbf16>
    %24 = vector.shape_cast %23 : vector<8x8x128xbf16> to vector<64x128xbf16>
    %c512 = arith.constant 512 : index
    %c0_12 = arith.constant 0 : index
    %25 = vector.load %arg3[%c512, %c0_12] : memref<1152x128xbf16, #tpu.memory_space<vmem>>, vector<128x128xbf16>
    %cst_13 = arith.constant dense<0.000000e+00> : vector<64x128xf32>
    %26 = tpu.matmul %24, %25, %cst_13 {dimension_numbers = #tpu.dot_dimension_numbers<[1], [0], [0], [1], [0, 0, 1, 1], [], []>} : vector<64x128xbf16>, vector<128x128xbf16>, vector<64x128xf32> -> vector<64x128xf32>
    %27 = arith.addf %22, %26 : vector<64x128xf32>
    %28 = vector.extract_strided_slice %1 {offsets = [1, 2, 0], sizes = [8, 8, 128], strides = [1, 1, 1]} : vector<10x10x128xbf16> to vector<8x8x128xbf16>
    %29 = vector.shape_cast %28 : vector<8x8x128xbf16> to vector<64x128xbf16>
    %c640 = arith.constant 640 : index
    %c0_14 = arith.constant 0 : index
    %30 = vector.load %arg3[%c640, %c0_14] : memref<1152x128xbf16, #tpu.memory_space<vmem>>, vector<128x128xbf16>
    %cst_15 = arith.constant dense<0.000000e+00> : vector<64x128xf32>
    %31 = tpu.matmul %29, %30, %cst_15 {dimension_numbers = #tpu.dot_dimension_numbers<[1], [0], [0], [1], [0, 0, 1, 1], [], []>} : vector<64x128xbf16>, vector<128x128xbf16>, vector<64x128xf32> -> vector<64x128xf32>
    %32 = arith.addf %27, %31 : vector<64x128xf32>
    %33 = vector.extract_strided_slice %1 {offsets = [2, 0, 0], sizes = [8, 8, 128], strides = [1, 1, 1]} : vector<10x10x128xbf16> to vector<8x8x128xbf16>
    %34 = vector.shape_cast %33 : vector<8x8x128xbf16> to vector<64x128xbf16>
    %c768 = arith.constant 768 : index
    %c0_16 = arith.constant 0 : index
    %35 = vector.load %arg3[%c768, %c0_16] : memref<1152x128xbf16, #tpu.memory_space<vmem>>, vector<128x128xbf16>
    %cst_17 = arith.constant dense<0.000000e+00> : vector<64x128xf32>
    %36 = tpu.matmul %34, %35, %cst_17 {dimension_numbers = #tpu.dot_dimension_numbers<[1], [0], [0], [1], [0, 0, 1, 1], [], []>} : vector<64x128xbf16>, vector<128x128xbf16>, vector<64x128xf32> -> vector<64x128xf32>
    %37 = arith.addf %32, %36 : vector<64x128xf32>
    %38 = vector.extract_strided_slice %1 {offsets = [2, 1, 0], sizes = [8, 8, 128], strides = [1, 1, 1]} : vector<10x10x128xbf16> to vector<8x8x128xbf16>
    %39 = vector.shape_cast %38 : vector<8x8x128xbf16> to vector<64x128xbf16>
    %c896 = arith.constant 896 : index
    %c0_18 = arith.constant 0 : index
    %40 = vector.load %arg3[%c896, %c0_18] : memref<1152x128xbf16, #tpu.memory_space<vmem>>, vector<128x128xbf16>
    %cst_19 = arith.constant dense<0.000000e+00> : vector<64x128xf32>
    %41 = tpu.matmul %39, %40, %cst_19 {dimension_numbers = #tpu.dot_dimension_numbers<[1], [0], [0], [1], [0, 0, 1, 1], [], []>} : vector<64x128xbf16>, vector<128x128xbf16>, vector<64x128xf32> -> vector<64x128xf32>
    %42 = arith.addf %37, %41 : vector<64x128xf32>
    %43 = vector.extract_strided_slice %1 {offsets = [2, 2, 0], sizes = [8, 8, 128], strides = [1, 1, 1]} : vector<10x10x128xbf16> to vector<8x8x128xbf16>
    %44 = vector.shape_cast %43 : vector<8x8x128xbf16> to vector<64x128xbf16>
    %c1024 = arith.constant 1024 : index
    %c0_20 = arith.constant 0 : index
    %45 = vector.load %arg3[%c1024, %c0_20] : memref<1152x128xbf16, #tpu.memory_space<vmem>>, vector<128x128xbf16>
    %cst_21 = arith.constant dense<0.000000e+00> : vector<64x128xf32>
    %46 = tpu.matmul %44, %45, %cst_21 {dimension_numbers = #tpu.dot_dimension_numbers<[1], [0], [0], [1], [0, 0, 1, 1], [], []>} : vector<64x128xbf16>, vector<128x128xbf16>, vector<64x128xf32> -> vector<64x128xf32>
    %47 = arith.addf %42, %46 : vector<64x128xf32>
    %48 = arith.truncf %47 : vector<64x128xf32> to vector<64x128xbf16>
    %c0_22 = arith.constant 0 : index
    %c0_23 = arith.constant 0 : index
    %c0_24 = arith.constant 0 : index
    %49 = vector.load %arg4[%c0_22, %c0_23, %c0_24] : memref<1x64x128xbf16, #tpu.memory_space<vmem>>, vector<1x64x128xbf16>
    %50 = vector.shape_cast %49 : vector<1x64x128xbf16> to vector<64x128xbf16>
    %51 = vector.shape_cast %48 : vector<64x128xbf16> to vector<1x64x128xbf16>
    tpu.vector_store %arg4[%c0_22, %c0_23, %c0_24], %51 {strides = array<i32>} : memref<1x64x128xbf16, #tpu.memory_space<vmem>>, vector<1x64x128xbf16>,
    %cst_25 = arith.constant dense<0.000000e+00> : vector<128xf32>
    %52 = vector.multi_reduction <add>, %47, %cst_25 [0] : vector<64x128xf32> to vector<128xf32>
    %53 = vector.shape_cast %52 : vector<128xf32> to vector<1x128xf32>
    %c0_26 = arith.constant 0 : index
    %c0_27 = arith.constant 0 : index
    %c0_28 = arith.constant 0 : index
    %54 = vector.load %arg5[%c0_26, %c0_27, %c0_28] : memref<1x1x128xf32, #tpu.memory_space<vmem>>, vector<1x1x128xf32>
    %55 = vector.shape_cast %54 : vector<1x1x128xf32> to vector<1x128xf32>
    %56 = vector.shape_cast %53 : vector<1x128xf32> to vector<1x1x128xf32>
    tpu.vector_store %arg5[%c0_26, %c0_27, %c0_28], %56 {strides = array<i32>} : memref<1x1x128xf32, #tpu.memory_space<vmem>>, vector<1x1x128xf32>,
    %57 = arith.mulf %47, %47 : vector<64x128xf32>
    %cst_29 = arith.constant dense<0.000000e+00> : vector<128xf32>
    %58 = vector.multi_reduction <add>, %57, %cst_29 [0] : vector<64x128xf32> to vector<128xf32>
    %59 = vector.shape_cast %58 : vector<128xf32> to vector<1x128xf32>
    %c0_30 = arith.constant 0 : index
    %c0_31 = arith.constant 0 : index
    %c0_32 = arith.constant 0 : index
    %60 = vector.load %arg6[%c0_30, %c0_31, %c0_32] : memref<1x1x128xf32, #tpu.memory_space<vmem>>, vector<1x1x128xf32>
    %61 = vector.shape_cast %60 : vector<1x1x128xf32> to vector<1x128xf32>
    %62 = vector.shape_cast %59 : vector<1x128xf32> to vector<1x1x128xf32>
    tpu.vector_store %arg6[%c0_30, %c0_31, %c0_32], %62 {strides = array<i32>} : memref<1x1x128xf32, #tpu.memory_space<vmem>>, vector<1x1x128xf32>,
    return
  }
  func.func @transform_0(%arg0: i32, %arg1: i32) -> (i32, i32, i32, i32) {
    %c0_i32 = arith.constant 0 : i32
    %c0_i32_0 = arith.constant 0 : i32
    %c0_i32_1 = arith.constant 0 : i32
    %c0_i32_2 = arith.constant 0 : i32
    return %arg0, %c0_i32, %c0_i32_0, %c0_i32_1 : i32, i32, i32, i32
  }
  func.func @transform_1(%arg0: i32, %arg1: i32) -> (i32, i32) {
    %c0_i32 = arith.constant 0 : i32
    %c0_i32_0 = arith.constant 0 : i32
    return %c0_i32, %arg1 : i32, i32
  }
  func.func @transform_2(%arg0: i32, %arg1: i32) -> (i32, i32, i32) {
    %c0_i32 = arith.constant 0 : i32
    %c0_i32_0 = arith.constant 0 : i32
    return %arg0, %c0_i32, %arg1 : i32, i32, i32
  }
  func.func @transform_3(%arg0: i32, %arg1: i32) -> (i32, i32, i32) {
    %c0_i32 = arith.constant 0 : i32
    %c0_i32_0 = arith.constant 0 : i32
    return %arg0, %c0_i32, %arg1 : i32, i32, i32
  }
  func.func @transform_4(%arg0: i32, %arg1: i32) -> (i32, i32, i32) {
    %c0_i32 = arith.constant 0 : i32
    %c0_i32_0 = arith.constant 0 : i32
    return %arg0, %c0_i32, %arg1 : i32, i32, i32
  }
}

</mosaic_0001>

<bundles_post_ra>
// kernel: tpu_custom_call.1
= control target key start
LH: loop header
LB: loop body
LE: loop exit
PB: predicated region body
PF: predicated region fallthrough
CT: control target
= control target key end

     0   :  { %10 = vsyncpa [#allocation3], 0  ;;  %s3503_s0 = inlined_call_operand.vmem [shape: bf16[2,10,10,128], index: 0, kind: input, shape index: {}]   ;;  %s3504_s1 = inlined_call_operand.hbm [shape: bf16[1152,128], index: 1, kind: input, shape index: {}]   ;;  %s3505_s2 = inlined_call_operand.hbm [shape: bf16[2,64,128], index: 2, kind: output, shape index: {0}]   ;;  %s3506_s3 = inlined_call_operand.hbm [shape: f32[2,1,128], index: 3, kind: output, shape index: {1}]   ;;  %s3507_s4 = inlined_call_operand.hbm [shape: f32[2,1,128], index: 4, kind: output, shape index: {2}]  }
   0x1   :  { %11 = vsyncpa [#allocation4], 0 }
   0x2   :  { %13 = vsyncpa [#allocation4 + $0x1], 0 }
   0x3   :  { %14 = vsyncpa [#allocation7], 0 }
   0x4   :  { %16 = vsyncpa [#allocation7 + $0x1], 0  ;;  %s2984_s15 = smov 0   ;;  %s2986_s16 = smov 0  }
   0x5   :  { %s2988_s17 = smov 0   ;;  %s2990_s18 = smov 0  }
   0x6   :  { %s2992_s19 = smov 0   ;;  %s2994_s20 = smov 0  }
   0x7 LB: > { %s3015_s21 = sadd.s32 4294967295, %s2949_s20   ;;  %s2049_s22 = sadd.s32 4294967294, %s2949_s20   ;;  %s2949_s20 = sphi %s2994_s20, %s22_s20   ;;  %s2945_s19 = sphi %s2992_s19, %s3528_s19   ;;  %s2941_s18 = sphi %s2990_s18, %s3527_s18   ;;  %s2937_s17 = sphi %s2988_s17, %s3526_s17   ;;  %s2933_s16 = sphi %s2986_s16, %s3525_s16   ;;  %s2929_s15 = sphi %s2984_s15, %s3524_s15  }
   0x8   : > { %s34_s23 = sadd.s32 1, %s2945_s19  ;;  %s95_s24 = sadd.s32 1, %s2937_s17 }
   0x9   : > { %p36_p0 = scmp.ge.s32.totalorder %s34_s23, 2  ;;  %p105_p1 = scmp.ne.s32.totalorder %s2937_s17, %s2933_s16 }
   0xa   : > { %p106_p2 = scmp.eq.s32.totalorder %s3015_s21, 1  ;;  %p111_p3 = scmp.ne.s32.totalorder %s2933_s16, %s2929_s15 }
   0xb   : > { %s3530_s23 = smov (%p36_p0, %s34_s23), 0  ;;  %p112_p5 = scmp.eq.s32.totalorder %s2049_s22, 1 }
   0xc   : > { %p3027_p4 = por %p106_p2, %p105_p1  ;;  %s90_s26 = ssub.s32 %s2945_s19, %s3530_s23 }
   0xd   : > { %p2050_p6 = scmp.ge.s32.totalorder %s2949_s20, 1  ;;  %p93_p7 = scmp.eq.s32.totalorder %s90_s26, 0 }
   0xe   : > { %s3511_s25 = scalar_select %p3027_p4, 1, 0 }
   0xf   : > { %p3036_p8 = por %p112_p5, %p111_p3  ;;  %p175_p9 = scmp.lt.s32.totalorder %s2949_s20, 3 }
  0x10   : > { %s3042_s28 = scalar_select %p93_p7, %s2937_s17, %s95_s24  }
  0x11   : > { %s3512_s27 = scalar_select %p3036_p8, 1, 0 }
  0x12   : > { %p3044_p10 = pnand %p2050_p6, %p175_p9  ;;  %p3508_p11 = scmp.eq.s32.totalorder %s3015_s21, 0 }
  0x13   : > { %s2951_s30 = smov [#allocation2]   ;;  %s2779_s9 = scalar_lea.hbm %s3504_s1, 9216 }
  0x14   : > { %s3513_s29 = scalar_select %p3044_p10, 1, 0 }
  0x15   : > { %p2628_p12 = pneg %p3044_p10  ;;  %s189_s5 = sshll.u32 %s2951_s30, 4  ;;  %s190_s5 = int_to_ptr.vmem [resolvable:$true] %s189_s5 }
  0x16   : > { %p2780_p0 = scmp.ne.s32.totalorder %s3504_s1, %s2779_s9  ;;  %p2786_p5 = scmp.lt.u32.totalorder %s2779_s9, %s3504_s1 }
  0x17   : > { %p3053_p13 = pnand %p3508_p11, %p2628_p12 }
  0x19   : > { %p2781_p1 = pneg %p3053_p13 }
  0x1b   : > { %p2782_p2 = pnand %p2781_p1, %p2780_p0 }
  0x1d   : > { %p2783_p3 = pneg %p2782_p2 }
  0x1f   : > { %p2788_p6 = pnand %p2786_p5, %p2783_p3 }
  0x21   : > { %2791 = shalt.err (!%p2788_p6)
}
  0x22   : > { %s2792_s14 = scalar_lea.vmem %s190_s5, 9216  ;;  %p2800_p11 = scmp.lt.s32.totalorder %s190_s5, %s190_s5 }
  0x23   : > { %p2793_p7 = scmp.ne.s32.totalorder %s190_s5, %s2792_s14  ;;  %p2801_p8 = scmp.lt.s32.totalorder %s2792_s14, %s2792_s14 }
  0x25   : > { %p2795_p9 = pnand %p2793_p7, %p2781_p1  ;;  %p2802_p4 = por %p2801_p8, %p2800_p11 }
  0x27   : > { %p2796_p12 = pneg %p2795_p9 }
  0x29   : > { %p2803_p10 = pnand %p2802_p4, %p2796_p12 }
  0x2b   : > { %2806 = shalt.err (!%p2803_p10)
}
  0x2c   : > { %s2952_s24 = smov 64   ;;  %s2953_s26 = smov 4  }
  0x2d   : > { %2631 = dma.hbm_to_vmem [thread:$0]  (!%p3053_p13), %s3504_s1, 9216, %s190_s5, [#allocation3], %s2952_s24, %s2952_s24, %s2953_s26  }
  0x2e   : > { %p3515_p0 = scmp.ne.s32.totalorder %s3513_s29, 0 }
  0x2f   : > { %p3516_p2 = scmp.eq.s32.totalorder (!%p3515_p0), %s3015_s21, 0 }
  0x30   : > { %213 = sbr.rel (%p3515_p0) target bundleno = 509 (0x1fd), region = 28 }
  0x37   : > { %2916 = dma.done.wait (%p3516_p2), [#allocation3], 9216   ;;  %p3517_p1 = pmov %p3516_p2 }
  0x38   : > { %v2698_v0 = vld [vmem:[#allocation2 + $0x40] sm:$0xff]   ;;  %p247_p4 = scmp.lt.s32.totalorder %s2941_s18, 1  ;;  %v2700_v2 = vld [vmem:[#allocation2 + $0x48] sm:$0xff]   ;;  %v2702_v4 = vld [vmem:[#allocation2 + $0x50] sm:$0xff]   ;;  %vm289_vm0 = vsmask.f32 3328 }
  0x39   : > { %2918 = vsyncadd (%p3517_p1), [#allocation3], 4294958080  ;;  %v2699_v1 = vld [vmem:[#allocation2 + $0x100] sm:$0xff]   ;;  %2321 = vmatprep.subr.bf16.mxu1 %v2698_v0  ;;  %v2701_v3 = vld [vmem:[#allocation2 + $0x108] sm:$0xff]   ;;  %vm290_vm1 = vsmask.f32 7440 }
  0x3a   : > { %2417 = vmatprep.subr.bf16.mxu0 %v2699_v1  ;;  %2322 = vmatpush3.bf16.msra.mxu1 %v2698_v0  ;;  %v2703_v5 = vld [vmem:[#allocation2 + $0x110] sm:$0xff]   ;;  %s248_s29 = scalar_select %p247_p4, %s2941_s18, 1  ;;  %v2704_v6 = vld [vmem:[#allocation2 + $0x58] sm:$0xff]   ;;  %v2706_v8 = vld [vmem:[#allocation2 + $0x60] sm:$0xff]   ;;  %vm694_vm3 = vcmask 1042432   ;;  %vm695_vm4 = vcmask 1046532  }
  0x3b   : > { %2418 = vmatpush3.bf16.msra.mxu0 %v2699_v1  ;;  %2323 = vmatprep.subr.bf16.mxu1 %v2700_v2  ;;  %v2705_v7 = vld [vmem:[#allocation2 + $0x118] sm:$0xff]   ;;  %v2707_v9 = vld [vmem:[#allocation2 + $0x120] sm:$0xff]   ;;  %v2708_v10 = vld [vmem:[#allocation2 + $0x68] sm:$0xff]   ;;  %s3358_s10 = sand.u32 1, %s2933_s16   ;;  %s2189_s14 = sshll.u32 %s2941_s18, 9 }
  0x3c   : > { %2419 = vmatprep.subr.bf16.mxu0 %v2701_v3  ;;  %s2617_s5 = smul.u32 80, %s248_s29  ;;  %v2709_v11 = vld [vmem:[#allocation2 + $0x128] sm:$0xff]   ;;  %v2710_v22 = vld [vmem:[#allocation2 + $0x70] sm:$0xff]   ;;  %vm3120_vm2 = vmor %vm289_vm0, %vm290_vm1  ;;  %s2055_s11 = sshll.u32 %s3358_s10, 5 }
  0x3d   : > { %v2711_v26 = vld [vmem:[#allocation2 + $0x130] sm:$0xff]   ;;  %v2712_v45 = vld [vmem:[#allocation2 + $0x78] sm:$0xff]   ;;  %v2714_v63 = vld [vmem:[#allocation2] sm:$0xff]   ;;  %s234_s12 = scalar_lea.vmem [#allocation5], %s2055_s11  ;;  %s3376_s30 = scalar_lea.hbm %s3505_s2, %s2189_s14 }
  0x3e   : > { %2324 = vmatpush3.bf16.msra.mxu1 %v2700_v2  ;;  %s3084_s9 = scalar_lea.vmem %s3503_s0, %s2617_s5  ;;  %v2713_v50 = vld [vmem:[#allocation2 + $0x138] sm:$0xff]   ;;  %vm3206_vm5 = vmor %vm694_vm3, %vm695_vm4  ;;  %v2742_v36 = vld [vmem:[#allocation2 + $0xa8] sm:$0xff]   ;;  %s1879_s13 = sshll.u32 %s234_s12, 4  ;;  %s3371_s13 = int_to_ptr.vmem [resolvable:$true] %s1879_s13 }
  0x3f   : > { %2420 = vmatpush3.bf16.msra.mxu0 %v2701_v3  ;;  %2325 = vmatprep.subr.bf16.mxu1 %v2702_v4  ;;  %v3087_v12 = vld [vmem:[%s3084_s9] sm:$0xf]  ;;  %v3090_v13 = vld [vmem:[%s3084_s9 + $0x4] sm:$0x1]  ;;  %v3093_v14 = vld [vmem:[%s3084_s9 + $0x8] sm:$0xf] }
  0x40   : > { %2421 = vmatprep.subr.bf16.mxu0 %v2703_v5  ;;  %v3096_v15 = vld [vmem:[%s3084_s9 + $0xc] sm:$0x1]  ;;  %v293_v16 = vshrl.u32 %v3087_v12, 16  ;;  %v296_v17 = vshll.u32 %v3087_v12, 16  ;;  %v302_v18 = vshll.u32 %v3090_v13, 16  ;;  %v307_v19 = vshrl.u32 %v3093_v14, 16 }
  0x41   : > { %v310_v20 = vshll.u32 %v3093_v14, 16  ;;  %v316_v21 = vshll.u32 %v3096_v15, 16  ;;  %v3105_v30 = vld [vmem:[%s3084_s9 + $0x10] sm:$0xf]  ;;  %v3108_v32 = vld [vmem:[%s3084_s9 + $0x14] sm:$0x1] }
  0x42   : > { %2326 = vmatpush3.bf16.msra.mxu1 %v2702_v4  ;;  %v295_v23 = vrot.slane %v293_v16, 4  ;;  %v298_v24 = vrot.slane %v296_v17, 5  ;;  %v309_v25 = vrot.slane %v307_v19, 4  ;;  %v304_v27 = vrot.slane %v302_v18, 5  ;;  %v3111_v33 = vld [vmem:[%s3084_s9 + $0x18] sm:$0xf] }
  0x43   : > { %2422 = vmatpush3.bf16.msra.mxu0 %v2703_v5  ;;  %2327 = vmatprep.subr.bf16.mxu1 %v2704_v6  ;;  %v312_v28 = vrot.slane %v310_v20, 5  ;;  %v318_v29 = vrot.slane %v316_v21, 5  ;;  %v3114_v34 = vld [vmem:[%s3084_s9 + $0x1c] sm:$0x1]  ;;  %v2101_v35 = vcombine.low %v3093_v14, %v3105_v30  ;;  %v321_v38 = vshrl.u32 %v3105_v30, 16  ;;  %v2715_v3 = vld [vmem:[#allocation2 + $0x140] sm:$0xff]  }
  0x44   : > { %2423 = vmatprep.subr.bf16.mxu0 %v2705_v7  ;;  %v299_v31 = vor.u32 %v298_v24, %v295_v23  ;;  %v324_v39 = vshll.u32 %v3105_v30, 16  ;;  %v330_v40 = vshll.u32 %v3108_v32, 16  ;;  %v335_v42 = vshrl.u32 %v3111_v33, 16  ;;  %v3131_v49 = vld [vmem:[%s3084_s9 + $0x20] sm:$0xf]  ;;  %v2716_v17 = vld [vmem:[#allocation2 + $0x8] sm:$0xff]  }
  0x45   : > { %v313_v37 = vor.u32 %v312_v28, %v309_v25  ;;  %v338_v43 = vshll.u32 %v3111_v33, 16  ;;  %v344_v44 = vshll.u32 %v3114_v34, 16  ;;  %v323_v47 = vrot.slane %v321_v38, 4  ;;  %v3136_v54 = vld [vmem:[%s3084_s9 + $0x24] sm:$0x1]  ;;  %v2717_v21 = vld [vmem:[#allocation2 + $0x148] sm:$0xff]  }
  0x46   : > { %2328 = vmatpush3.bf16.msra.mxu1 %v2704_v6  ;;  %v300_v41 = vrot.slane %v299_v31, 4  ;;  %v326_v48 = vrot.slane %v324_v39, 5  ;;  %v337_v52 = vrot.slane %v335_v42, 4  ;;  %v332_v57 = vrot.slane %v330_v40, 5  ;;  %v2718_v24 = vld [vmem:[#allocation2 + $0x10] sm:$0xff]   ;;  %v2720_v31 = vld [vmem:[#allocation2 + $0x18] sm:$0xff]  }
  0x47   : > { %2424 = vmatpush3.bf16.msra.mxu0 %v2705_v7  ;;  %2329 = vmatprep.subr.bf16.mxu1 %v2706_v8  ;;  %v314_v46 = vrot.slane %v313_v37, 4  ;;  %v340_v53 = vrot.slane %v338_v43, 5  ;;  %v346_v58 = vrot.slane %v344_v44, 5  ;;  %v349_v61 = vshrl.u32 %v3131_v49, 16  ;;  %v3157_v25 = vld [vmem:[%s3084_s9 + $0x28] sm:$0xf] }
  0x48   : > { %2425 = vmatprep.subr.bf16.mxu0 %v2707_v9  ;;  %v305_v51 = vsel %vm3120_vm2, %v300_v41, %v304_v27  ;;  %v327_v56 = vor.u32 %v326_v48, %v323_v47  ;;  %v352_v62 = vshll.u32 %v3131_v49, 16  ;;  %v358_v1 = vshll.u32 %v3136_v54, 16  ;;  %v3166_v38 = vld [vmem:[%s3084_s9 + $0x30] sm:$0xf]  ;;  %v3169_v41 = vld [vmem:[%s3084_s9 + $0x34] sm:$0x1] }
  0x49   : > { %v319_v55 = vsel %vm3120_vm2, %v314_v46, %v318_v29  ;;  %v341_v60 = vor.u32 %v340_v53, %v337_v52  ;;  %v351_v4 = vrot.slane %v349_v61, 4  ;;  %v2102_v6 = vcombine.low %v3111_v33, %v3131_v49  ;;  %v2719_v29 = vld [vmem:[#allocation2 + $0x150] sm:$0xff]   ;;  %v3178_v52 = vld [vmem:[%s3084_s9 + $0x38] sm:$0xf]  ;;  %s1857_s7 = scalar_lea.sflag [#allocation4], %s3358_s10  ;;  %s2807_s29 = scalar_lea.vmem %s3371_s13, 512 }
  0x4a   : > { %2330 = vmatpush3.bf16.msra.mxu1 %v2706_v8  ;;  %v2057_v59 = vcombine.low %v305_v51, %v319_v55  ;;  %v328_v0 = vrot.slane %v327_v56, 4  ;;  %v354_v5 = vrot.slane %v352_v62, 5  ;;  %v360_v8 = vrot.slane %v358_v1, 5  ;;  %v2721_v53 = vld [vmem:[#allocation2 + $0x158] sm:$0xff]   ;;  %p2808_p8 = scmp.ne.s32.totalorder %s3371_s13, %s2807_s29  ;;  %p3522_p10 = scmp.ne.s32.totalorder %s3511_s25, 0 }
  0x4b   : > { %2426 = vmatpush3.bf16.msra.mxu0 %v2707_v9  ;;  %2331 = vmatprep.subr.bf16.mxu1 %v2708_v10  ;;  %v342_v2 = vrot.slane %v341_v60, 4  ;;  %v703_v19 = vrot.slane %v3096_v15, 5  ;;  %v363_v27 = vshrl.u32 %v3157_v25, 16  ;;  %v366_v28 = vshll.u32 %v3157_v25, 16  ;;  %s2954_s5 = smov [#allocation5]  }
  0x4c   : > { %2427 = vmatprep.subr.bf16.mxu0 %v2709_v11  ;;  %2337 = vmatprep.mubr.bf16.mxu1 %v2057_v59  ;;  %v333_v7 = vsel %vm3120_vm2, %v328_v0, %v332_v57  ;;  %v377_v42 = vshrl.u32 %v3166_v38, 16  ;;  %v380_v43 = vshll.u32 %v3166_v38, 16  ;;  %v386_v44 = vshll.u32 %v3169_v41, 16  ;;  %v3181_v57 = vld [vmem:[%s3084_s9 + $0x3c] sm:$0x1]  ;;  %p2809_p11 = pnand %p2808_p8, %p3522_p10  ;;  %s2811_s6 = sshll.u32 %s2954_s5, 4  ;;  %s2812_s6 = int_to_ptr.vmem [resolvable:$false] %s2811_s6 }
  0x4d   : > { %v347_v9 = vsel %vm3120_vm2, %v342_v2, %v346_v58  ;;  %v365_v39 = vrot.slane %v363_v27, 4  ;;  %v368_v40 = vrot.slane %v366_v28, 5  ;;  %v2103_v46 = vcombine.low %v3157_v25, %v3166_v38  ;;  %v3190_v0 = vld [vmem:[%s3084_s9 + $0x44] sm:$0x1]  ;;  %s2813_s8 = scalar_lea.vmem %s2812_s6, 1024  ;;  %p2814_p3 = scmp.lt.s32.totalorder %s3371_s13, %s2812_s6 }
  0x4e   : > { %2332 = vmatpush3.bf16.msra.mxu1 %v2708_v10  ;;  %v2113_v10 = vcombine.low %v319_v55, %v333_v7  ;;  %v3149_v16 = vcombine.low %v333_v7, %v347_v9  ;;  %v382_v51 = vrot.slane %v380_v43, 5  ;;  %v2722_v55 = vld [vmem:[#allocation2 + $0x20] sm:$0xff]   ;;  %v388_v56 = vrot.slane %v386_v44, 5  ;;  %v2725_v44 = vld [vmem:[#allocation2 + $0x168] sm:$0xff]   ;;  %p2810_p13 = pneg %p2809_p11  ;;  %p2815_p5 = scmp.lt.s32.totalorder %s2813_s8, %s2807_s29 }
  0x4f   : > { %2428 = vmatpush3.bf16.msra.mxu0 %v2709_v11  ;;  %2333 = vmatprep.subr.bf16.mxu1 %v2710_v22  ;;  %v355_v11 = vor.u32 %v354_v5, %v351_v4  ;;  %v369_v47 = vor.u32 %v368_v40, %v365_v39  ;;  %v391_v58 = vshrl.u32 %v3178_v52, 16  ;;  %v394_v59 = vshll.u32 %v3178_v52, 16 }
  0x50   : > { %2429 = vmatprep.subr.bf16.mxu0 %v2711_v26  ;;  %2433 = vmatprep.mubr.bf16.mxu0 %v2113_v10  ;;  %v400_v62 = vshll.u32 %v3181_v57, 16  ;;  %v2723_v10 = vld [vmem:[#allocation2 + $0x160] sm:$0xff]   ;;  %v2083_v27 = vrot.slane %v3105_v30, 9  ;;  %v2069_v43 = vcombine.low %v3087_v12, %v3093_v14  ;;  %p2816_p6 = por %p2815_p5, %p2814_p3 }
  0x51   : > { %v356_v18 = vrot.slane %v355_v11, 4  ;;  %v370_v60 = vrot.slane %v369_v47, 4  ;;  %v393_v1 = vrot.slane %v391_v58, 4  ;;  %v396_v2 = vrot.slane %v394_v59, 5  ;;  %v2729_v59 = vld [vmem:[#allocation2 + $0x178] sm:$0xff]  }
  0x52   : > { %2334 = vmatpush3.bf16.msra.mxu1 %v2710_v22  ;;  %v707_v22 = vrot.slane %v3108_v32, 5  ;;  %v699_v32 = vrot.slane %v3090_v13, 5  ;;  %v2084_v58 = vrot.slane %v3111_v33, 9  ;;  %p2817_p7 = pnand %p2816_p6, %p2810_p13 }
  0x53   : > { %2430 = vmatpush3.bf16.msra.mxu0 %v2711_v26  ;;  %2335 = vmatprep.subr.bf16.mxu1 %v2712_v45  ;;  %v361_v20 = vsel %vm3120_vm2, %v356_v18, %v360_v8  ;;  %v3160_v26 = vld [vmem:[%s3084_s9 + $0x2c] sm:$0x1]  ;;  %v402_v8 = vrot.slane %v400_v62, 5  ;;  %v2086_v62 = vrot.slane %v3157_v25, 9 }
  0x54   : > { %2431 = vmatprep.subr.bf16.mxu0 %v2713_v50  ;;  %v2114_v23 = vcombine.low %v347_v9, %v361_v20  ;;  %v372_v37 = vshll.u32 %v3160_v26, 16  ;;  %v1039_v9 = vshll.u32 %v3190_v0, 16 }
  0x56   : > { %2336 = vmatpush3.bf16.msra.mxu1 %v2712_v45  ;;  %v2082_v45 = vrot.slane %v3093_v14, 9  ;;  %v374_v48 = vrot.slane %v372_v37, 5  ;;  %v1041_v40 = vrot.slane %v1039_v9, 5  ;;  %v2732_v9 = vld [vmem:[#allocation2 + $0x180] sm:$0xff]   ;;  %v2764_v14 = vld [vmem:[#allocation2 + $0x1f0] sm:$0xff]  }
  0x57   : > { %2432 = vmatpush3.bf16.msra.mxu0 %v2713_v50  ;;  %2345 = vmatprep.subr.bf16.mxu1 %v2714_v63  ;;  %v379_v50 = vrot.slane %v377_v42, 4 }
  0x58   : > { %2441 = vmatprep.subr.bf16.mxu0 %v2715_v3  ;;  %v375_v5 = vsel %vm3120_vm2, %v370_v60, %v374_v48  ;;  %v3221_v48 = vsel %vm3206_vm5, %v2082_v45, %v703_v19  ;;  %v711_v45 = vrot.slane %v3114_v34, 5  ;;  %v2731_v60 = vld [vmem:[#allocation2 + $0x80] sm:$0xff]   ;;  %v719_v34 = vrot.slane %v3160_v26, 5 }
  0x59   : > { %2338 = vmatmul.mubr.bf16.vlgmr.msra.gmra.mrb[0].mxu1 %v3149_v16  ;;  %v383_v61 = vor.u32 %v382_v51, %v379_v50  ;;  %v3197_v11 = vcombine.low %v361_v20, %v375_v5  ;;  %v3227_v50 = vsel %vm3206_vm5, %v2083_v27, %v707_v22  ;;  %v2726_v51 = vld [vmem:[#allocation2 + $0x30] sm:$0xff]   ;;  %v2088_v27 = vrot.slane %v3178_v52, 9 }
  0x5a   : > { %2346 = vmatpush3.bf16.msra.mxu1 %v2714_v63  ;;  %2434 = vmatmul.mubr.bf16.vlgmr.msra.gmra.mrb[0].mxu0 %v2114_v23  ;;  %v3187_v63 = vld [vmem:[%s3084_s9 + $0x40] sm:$0xf]  ;;  %v2724_v23 = vld [vmem:[#allocation2 + $0x28] sm:$0xff]   ;;  %v2126_v19 = vcombine.low %v3221_v48, %v3227_v50  ;;  %v2727_v22 = vld [vmem:[#allocation2 + $0x170] sm:$0xff]   ;;  %v3258_v26 = vsel %vm3206_vm5, %v2084_v58, %v711_v45 }
  0x5b   : > { %2347 = vmatprep.subr.bf16.mxu1 %v2716_v17  ;;  %2442 = vmatpush3.bf16.msra.mxu0 %v2715_v3  ;;  %v1030_v3 = vshrl.u32 %v3187_v63, 16  ;;  %v1033_v4 = vshll.u32 %v3187_v63, 16  ;;  %v384_v7 = vrot.slane %v383_v61, 4  ;;  %v2104_v28 = vcombine.low %v3178_v52, %v3187_v63 }
  0x5c   : > { %2443 = vmatprep.subr.bf16.mxu0 %v2717_v21  ;;  %2341 = vmatprep.mubr.bf16.mxu1 %v3197_v11  ;;  %v2085_v61 = vrot.slane %v3131_v49, 9 }
  0x5d   : > { %v1032_v18 = vrot.slane %v1030_v3, 4  ;;  %v3251_v3 = vcombine.low %v3105_v30, %v3111_v33  ;;  %v2765_v30 = vld [vmem:[#allocation2 + $0xf8] sm:$0xff]   ;;  %v2775_v33 = vld [vmem:[#allocation2 + $0x220] sm:$0xff]  }
  0x5e   : > { %2348 = vmatpush3.bf16.msra.mxu1 %v2716_v17  ;;  %v397_v17 = vor.u32 %v396_v2, %v393_v1  ;;  %v3245_v1 = vld [vmem:[%s3084_s9 + $0x48] sm:$0xf]  ;;  %v1192_v2 = vrot.slane %v3190_v0, 5  ;;  %v723_v0 = vrot.slane %v3169_v41, 5 }
  0x5f   : > { %2349 = vmatprep.subr.bf16.mxu1 %v2718_v24  ;;  %2444 = vmatpush3.bf16.msra.mxu0 %v2717_v21  ;;  %v1035_v21 = vrot.slane %v1033_v4, 5  ;;  %v2087_v4 = vrot.slane %v3166_v38, 9  ;;  %v1482_v41 = vshrl.u32 %v3245_v1, 16 }
  0x60   : > { %2445 = vmatprep.subr.bf16.mxu0 %v2719_v29  ;;  %v398_v39 = vrot.slane %v397_v17, 4  ;;  %v2734_v17 = vld [vmem:[#allocation2 + $0x88] sm:$0xff]  }
  0x61   : > { %v1036_v20 = vor.u32 %v1035_v21, %v1032_v18  ;;  %v3267_v18 = vcombine.low %v3131_v49, %v3157_v25  ;;  %v2776_v49 = vld [vmem:[#allocation2 + $0x228] sm:$0xff]   ;;  %v2778_v25 = vld [vmem:[#allocation2 + $0x238] sm:$0xff]  }
  0x62   : > { %2350 = vmatpush3.bf16.msra.mxu1 %v2718_v24  ;;  %v389_v24 = vsel %vm3120_vm2, %v384_v7, %v388_v56  ;;  %v715_v56 = vrot.slane %v3136_v54, 5  ;;  %v2125_v54 = vrot.slane %v3187_v63, 9  ;;  %v2156_v7 = vrot.slane %v3245_v1, 9 }
  0x63   : > { %2351 = vmatprep.subr.bf16.mxu1 %v2720_v31  ;;  %2446 = vmatpush3.bf16.msra.mxu0 %v2719_v29  ;;  %v2115_v37 = vcombine.low %v375_v5, %v389_v24  ;;  %v1037_v42 = vrot.slane %v1036_v20, 4  ;;  %v272_v5 = vld [vmem:[%s3084_s9 + $0x4c] sm:$0x1]  ;;  %v2739_v29 = vld [vmem:[#allocation2 + $0x198] sm:$0xff]  }
  0x64   : > { %2447 = vmatprep.subr.bf16.mxu0 %v2721_v53  ;;  %v3271_v21 = vsel %vm3206_vm5, %v2125_v54, %v1192_v2  ;;  %v2735_v20 = vld [vmem:[#allocation2 + $0x188] sm:$0xff]   ;;  %v2745_v54 = vld [vmem:[#allocation2 + $0xb0] sm:$0xff]  }
  0x65   : > { %2437 = vmatprep.mubr.bf16.mxu0 %v2115_v37  ;;  %v2746_v2 = vld [vmem:[#allocation2 + $0x1b0] sm:$0xff]  }
  0x66   : > { %2352 = vmatpush3.bf16.msra.mxu1 %v2720_v31  ;;  %v403_v31 = vsel %vm3120_vm2, %v398_v39, %v402_v8  ;;  %v3262_v8 = vsel %vm3206_vm5, %v2085_v61, %v715_v56  ;;  %v1485_v39 = vshll.u32 %v3245_v1, 16  ;;  %v2737_v56 = vld [vmem:[#allocation2 + $0x190] sm:$0xff]  }
  0x67   : > { %2353 = vmatprep.subr.bf16.mxu1 %v2722_v55  ;;  %2448 = vmatpush3.bf16.msra.mxu0 %v2721_v53  ;;  %v3215_v47 = vcombine.low %v389_v24, %v403_v31  ;;  %v3231_v53 = vsel %vm3120_vm2, %v1037_v42, %v1041_v40  ;;  %v2127_v24 = vcombine.low %v3258_v26, %v3262_v8  ;;  %v2081_v42 = vrot.slane %v3087_v12, 9 }
  0x68   : > { %2449 = vmatprep.subr.bf16.mxu0 %v2723_v10  ;;  %v2116_v15 = vcombine.low %v403_v31, %v3231_v53  ;;  %v3287_v40 = vsel %vm3206_vm5, %v2086_v62, %v719_v34  ;;  %v3291_v31 = vsel %vm3206_vm5, %v2087_v4, %v723_v0  ;;  %v3300_v12 = vcombine.low %v3166_v38, %v3178_v52  ;;  %v2740_v34 = vld [vmem:[#allocation2 + $0xa0] sm:$0xff]   ;;  %v2748_v4 = vld [vmem:[#allocation2 + $0xb8] sm:$0xff]   ;;  %v2752_v0 = vld [vmem:[#allocation2 + $0xc8] sm:$0xff]  }
  0x69   : > { %2342 = vmatmul.mubr.bf16.gmra.mrb[4].mxu1 %v3215_v47 }
  0x6a   : > { %2354 = vmatpush3.bf16.msra.mxu1 %v2722_v55  ;;  %2361 = vmatprep.mubr.bf16.mxu1 %v2069_v43  ;;  %v2728_v55 = vld [vmem:[#allocation2 + $0x38] sm:$0xff]   ;;  %v1484_v43 = vrot.slane %v1482_v41, 4  ;;  %v2754_v41 = vld [vmem:[#allocation2 + $0xd0] sm:$0xff]  }
  0x6b   : > { %2355 = vmatprep.subr.bf16.mxu1 %v2724_v23  ;;  %2450 = vmatpush3.bf16.msra.mxu0 %v2723_v10  ;;  %v1638_v10 = vrot.slane %v272_v5, 5 }
  0x6c   : > { %2451 = vmatprep.subr.bf16.mxu0 %v2725_v44  ;;  %2438 = vmatmul.mubr.bf16.gmra.mrb[4].mxu0 %v2116_v15  ;;  %v2736_v15 = vld [vmem:[#allocation2 + $0x90] sm:$0xff]  }
  0x6d   : > { %2457 = vmatprep.mubr.bf16.mxu0 %v2126_v19  ;;  %v1491_v19 = vshll.u32 %v272_v5, 16  ;;  %v2749_v5 = vld [vmem:[#allocation2 + $0x1b8] sm:$0xff]  }
  0x6e   : > { %2356 = vmatpush3.bf16.msra.mxu1 %v2724_v23  ;;  %v3275_v23 = vsel %vm3206_vm5, %v2156_v7, %v1638_v10  ;;  %v2750_v7 = vld [vmem:[#allocation2 + $0xc0] sm:$0xff]   ;;  %v3323_v10 = vcombine.low %v3262_v8, %v3287_v40  ;;  %v2756_v8 = vld [vmem:[#allocation2 + $0xd8] sm:$0xff]  }
  0x6f   : > { %2357 = vmatprep.subr.bf16.mxu1 %v2726_v51  ;;  %2452 = vmatpush3.bf16.msra.mxu0 %v2725_v44  ;;  %v2157_v37 = vcombine.low %v3271_v21, %v3275_v23  ;;  %v727_v44 = vrot.slane %v3181_v57, 5  ;;  %v700_v57 = vsel %vm3206_vm5, %v2081_v42, %v699_v32  ;;  %v2773_v42 = vld [vmem:[#allocation2 + $0x210] sm:$0xff]  }
  0x70   : > { %2453 = vmatprep.subr.bf16.mxu0 %v2727_v22  ;;  %v2089_v61 = vcombine.low %v700_v57, %v3221_v48  ;;  %v2741_v48 = vld [vmem:[#allocation2 + $0x1a0] sm:$0xff]  }
  0x71   : > { %v728_v58 = vsel %vm3206_vm5, %v2088_v27, %v727_v44  ;;  %v2758_v27 = vld [vmem:[#allocation2 + $0xe0] sm:$0xff]  }
  0x72   : > { %2358 = vmatpush3.bf16.msra.mxu1 %v2726_v51  ;;  %v1487_v51 = vrot.slane %v1485_v39, 5  ;;  %v2129_v32 = vcombine.low %v728_v58, %v3271_v21  ;;  %v2759_v39 = vld [vmem:[#allocation2 + $0x1e0] sm:$0xff]  }
  0x73   : > { %2359 = vmatprep.subr.bf16.mxu1 %v2728_v55  ;;  %2454 = vmatpush3.bf16.msra.mxu0 %v2727_v22  ;;  %v2128_v22 = vcombine.low %v3287_v40, %v3291_v31  ;;  %v2762_v40 = vld [vmem:[#allocation2 + $0xf0] sm:$0xff]  }
  0x74   : > { %2455 = vmatprep.subr.bf16.mxu0 %v2729_v59  ;;  %v1488_v45 = vor.u32 %v1487_v51, %v1484_v43  ;;  %v2774_v43 = vld [vmem:[#allocation2 + $0x218] sm:$0xff]  }
  0x76   : > { %2360 = vmatpush3.bf16.msra.mxu1 %v2728_v55  ;;  %v1493_v55 = vrot.slane %v1491_v19, 5 }
  0x77   : > { %2369 = vmatprep.subr.bf16.mxu1 %v2731_v60  ;;  %2456 = vmatpush3.bf16.msra.mxu0 %v2729_v59  ;;  %v1489_v59 = vrot.slane %v1488_v45, 4 }
  0x78   : > { %2465 = vmatprep.subr.bf16.mxu0 %v2732_v9 }
  0x79   : > { %2362 = vmatmul.mubr.bf16.vlgmr.msra.gmra.mrb[0].mxu1 %v3251_v3  ;;  %v1494_v13 = vsel %vm3120_vm2, %v1489_v59, %v1493_v55 }
  0x7a   : > { %2370 = vmatpush3.bf16.msra.mxu1 %v2731_v60  ;;  %2365 = vmatprep.mubr.bf16.mxu1 %v3267_v18  ;;  %v2738_v60 = vld [vmem:[#allocation2 + $0x98] sm:$0xff]   ;;  %v3314_v62 = vcombine.low %v3231_v53, %v1494_v13  ;;  %v2743_v53 = vld [vmem:[#allocation2 + $0x1a8] sm:$0xff]  }
  0x7b   : > { %2371 = vmatprep.subr.bf16.mxu1 %v2734_v17  ;;  %2458 = vmatmul.mubr.bf16.vlgmr.msra.gmra.mrb[0].mxu0 %v2127_v24  ;;  %v2138_v24 = vcombine.low %v3187_v63, %v3245_v1  ;;  %v2761_v1 = vld [vmem:[#allocation2 + $0x1e8] sm:$0xff]  }
  0x7c   : > { %2466 = vmatpush3.bf16.msra.mxu0 %v2732_v9  ;;  %2461 = vmatprep.mubr.bf16.mxu0 %v2128_v22  ;;  %v2751_v9 = vld [vmem:[#allocation2 + $0x1c0] sm:$0xff]  }
  0x7d   : > { %2467 = vmatprep.subr.bf16.mxu0 %v2735_v20 }
  0x7e   : > { %2372 = vmatpush3.bf16.msra.mxu1 %v2734_v17  ;;  %v2753_v17 = vld [vmem:[#allocation2 + $0x1c8] sm:$0xff]  }
  0x7f   : > { %2373 = vmatprep.subr.bf16.mxu1 %v2736_v15 }
  0x80   : > { %2468 = vmatpush3.bf16.msra.mxu0 %v2735_v20  ;;  %v2760_v20 = vld [vmem:[#allocation2 + $0xe8] sm:$0xff]  }
  0x81   : > { %2366 = vmatmul.mubr.bf16.gmra.mrb[4].mxu1 %v3300_v12  ;;  %2469 = vmatprep.subr.bf16.mxu0 %v2737_v56 }
  0x82   : > { %2374 = vmatpush3.bf16.msra.mxu1 %v2736_v15  ;;  %2385 = vmatprep.mubr.bf16.mxu1 %v2089_v61 }
  0x83   : > { %2375 = vmatprep.subr.bf16.mxu1 %v2738_v60  ;;  %2462 = vmatmul.mubr.bf16.gmra.mrb[4].mxu0 %v2129_v32 }
  0x84   : > { %2470 = vmatpush3.bf16.msra.mxu0 %v2737_v56  ;;  %2481 = vmatprep.mubr.bf16.mxu0 %v3251_v3  ;;  %v3319_v3 = vcombine.low %v3227_v50, %v3258_v26  ;;  %v3329_v50 = vcombine.low %v3291_v31, %v728_v58  ;;  %v2755_v26 = vld [vmem:[#allocation2 + $0x1d0] sm:$0xff]   ;;  %v2769_v31 = vld [vmem:[#allocation2 + $0x200] sm:$0xff]  }
  0x85   : > { %2471 = vmatprep.subr.bf16.mxu0 %v2739_v29 }
  0x86   : > { %2376 = vmatpush3.bf16.msra.mxu1 %v2738_v60 }
  0x87   : > { %2377 = vmatprep.subr.bf16.mxu1 %v2740_v34 }
  0x88   : > { %2472 = vmatpush3.bf16.msra.mxu0 %v2739_v29 }
  0x89   : > { %2473 = vmatprep.subr.bf16.mxu0 %v2741_v48 }
  0x8a   : > { %2378 = vmatpush3.bf16.msra.mxu1 %v2740_v34 }
  0x8b   : > { %2379 = vmatprep.subr.bf16.mxu1 %v2742_v36 }
  0x8c   : > { %2474 = vmatpush3.bf16.msra.mxu0 %v2741_v48 }
  0x8d   : > { %2475 = vmatprep.subr.bf16.mxu0 %v2743_v53 }
  0x8e   : > { %2380 = vmatpush3.bf16.msra.mxu1 %v2742_v36 }
  0x8f   : > { %2381 = vmatprep.subr.bf16.mxu1 %v2745_v54 }
  0x90   : > { %2476 = vmatpush3.bf16.msra.mxu0 %v2743_v53 }
  0x91   : > { %2477 = vmatprep.subr.bf16.mxu0 %v2746_v2 }
  0x92   : > { %2382 = vmatpush3.bf16.msra.mxu1 %v2745_v54 }
  0x93   : > { %2383 = vmatprep.subr.bf16.mxu1 %v2748_v4 }
  0x94   : > { %2478 = vmatpush3.bf16.msra.mxu0 %v2746_v2 }
  0x95   : > { %2479 = vmatprep.subr.bf16.mxu0 %v2749_v5 }
  0x96   : > { %2384 = vmatpush3.bf16.msra.mxu1 %v2748_v4 }
  0x97   : > { %2393 = vmatprep.subr.bf16.mxu1 %v2750_v7 }
  0x98   : > { %2480 = vmatpush3.bf16.msra.mxu0 %v2749_v5 }
  0x99   : > { %2386 = vmatmul.mubr.bf16.vlgmr.msra.gmra.mrb[0].mxu1 %v3319_v3  ;;  %2489 = vmatprep.subr.bf16.mxu0 %v2751_v9 }
  0x9a   : > { %2394 = vmatpush3.bf16.msra.mxu1 %v2750_v7  ;;  %2389 = vmatprep.mubr.bf16.mxu1 %v3323_v10 }
  0x9b   : > { %2395 = vmatprep.subr.bf16.mxu1 %v2752_v0  ;;  %2482 = vmatmul.mubr.bf16.vlgmr.msra.gmra.mrb[0].mxu0 %v3267_v18  ;;  %v2757_v18 = vld [vmem:[#allocation2 + $0x1d8] sm:$0xff]  }
  0x9c   : > { %2490 = vmatpush3.bf16.msra.mxu0 %v2751_v9  ;;  %2485 = vmatprep.mubr.bf16.mxu0 %v3300_v12 }
  0x9d   : > { %2491 = vmatprep.subr.bf16.mxu0 %v2753_v17 }
  0x9e   : > { %2396 = vmatpush3.bf16.msra.mxu1 %v2752_v0 }
  0x9f   : > { %2397 = vmatprep.subr.bf16.mxu1 %v2754_v41 }
  0xa0   : > { %2492 = vmatpush3.bf16.msra.mxu0 %v2753_v17 }
  0xa1   : > { %2390 = vmatmul.mubr.bf16.gmra.mrb[4].mxu1 %v3329_v50  ;;  %2493 = vmatprep.subr.bf16.mxu0 %v2755_v26 }
  0xa2   : > { %2398 = vmatpush3.bf16.msra.mxu1 %v2754_v41  ;;  %2409 = vmatprep.mubr.bf16.mxu1 %v2101_v35  ;;  %v2766_v35 = vld [vmem:[#allocation2 + $0x1f8] sm:$0xff]  }
  0xa3   : > { %2399 = vmatprep.subr.bf16.mxu1 %v2756_v8  ;;  %2486 = vmatmul.mubr.bf16.gmra.mrb[4].mxu0 %v2138_v24 }
  0xa4   : > { %2494 = vmatpush3.bf16.msra.mxu0 %v2755_v26  ;;  %2505 = vmatprep.mubr.bf16.mxu0 %v3149_v16  ;;  %v2770_v16 = vld [vmem:[#allocation2 + $0x208] sm:$0xff]  }
  0xa5   : > { %2495 = vmatprep.subr.bf16.mxu0 %v2757_v18 }
  0xa6   : > { %2400 = vmatpush3.bf16.msra.mxu1 %v2756_v8 }
  0xa7   : > { %2401 = vmatprep.subr.bf16.mxu1 %v2758_v27 }
  0xa8   : > { %2496 = vmatpush3.bf16.msra.mxu0 %v2757_v18 }
  0xa9   : > { %2497 = vmatprep.subr.bf16.mxu0 %v2759_v39 }
  0xaa   : > { %2402 = vmatpush3.bf16.msra.mxu1 %v2758_v27 }
  0xab   : > { %2403 = vmatprep.subr.bf16.mxu1 %v2760_v20 }
  0xac   : > { %2498 = vmatpush3.bf16.msra.mxu0 %v2759_v39 }
  0xad   : > { %2499 = vmatprep.subr.bf16.mxu0 %v2761_v1 }
  0xae   : > { %2404 = vmatpush3.bf16.msra.mxu1 %v2760_v20 }
  0xaf   : > { %2405 = vmatprep.subr.bf16.mxu1 %v2762_v40 }
  0xb0   : > { %2500 = vmatpush3.bf16.msra.mxu0 %v2761_v1 }
  0xb1   : > { %2501 = vmatprep.subr.bf16.mxu0 %v2764_v14 }
  0xb2   : > { %2406 = vmatpush3.bf16.msra.mxu1 %v2762_v40 }
  0xb3   : > { %2407 = vmatprep.subr.bf16.mxu1 %v2765_v30 }
  0xb4   : > { %2502 = vmatpush3.bf16.msra.mxu0 %v2764_v14 }
  0xb5   : > { %2503 = vmatprep.subr.bf16.mxu0 %v2766_v35 }
  0xb6   : > { %2408 = vmatpush3.bf16.msra.mxu1 %v2765_v30 }
  0xb7   : > { %2537 = vmatprep.subr.bf16.mxu1 %v2769_v31 }
  0xb8   : > { %2504 = vmatpush3.bf16.msra.mxu0 %v2766_v35 }
  0xb9   : > { %2410 = vmatmul.mubr.bf16.vlgmr.msra.gmra.mrb[0].mxu1 %v2102_v6  ;;  %2513 = vmatprep.subr.bf16.mxu0 %v2769_v31  ;;  %v2777_v6 = vld [vmem:[#allocation2 + $0x230] sm:$0xff]  }
  0xba   : > { %2545 = vmatpush3.bf16.msra.mxu1 %v2769_v31  ;;  %2413 = vmatprep.mubr.bf16.mxu1 %v2103_v46 }
  0xbb   : > { %2538 = vmatprep.subr.bf16.mxu1 %v2770_v16  ;;  %2506 = vmatmul.mubr.bf16.vlgmr.msra.gmra.mrb[0].mxu0 %v3197_v11 }
  0xbc   : > { %2514 = vmatpush3.bf16.msra.mxu0 %v2769_v31  ;;  %2509 = vmatprep.mubr.bf16.mxu0 %v3215_v47 }
  0xbd   : > { %2515 = vmatprep.subr.bf16.mxu0 %v2770_v16 }
  0xbe   : > { %2546 = vmatpush3.bf16.msra.mxu1 %v2770_v16 }
  0xbf   : > { %2539 = vmatprep.subr.bf16.mxu1 %v2773_v42 }
  0xc0   : > { %2516 = vmatpush3.bf16.msra.mxu0 %v2770_v16 }
  0xc1   : > { %2414 = vmatmul.mubr.bf16.gmra.mrb[4].mxu1 %v2104_v28  ;;  %2517 = vmatprep.subr.bf16.mxu0 %v2773_v42 }
  0xc2   : > { %2547 = vmatpush3.bf16.msra.mxu1 %v2773_v42  ;;  %2533 = vmatprep.mubr.bf16.mxu1 %v3329_v50 }
  0xc3   : > { %2540 = vmatprep.subr.bf16.mxu1 %v2774_v43  ;;  %2510 = vmatmul.mubr.bf16.gmra.mrb[4].mxu0 %v3314_v62 }
  0xc4   : > { %2518 = vmatpush3.bf16.msra.mxu0 %v2773_v42  ;;  %2529 = vmatprep.mubr.bf16.mxu0 %v3319_v3 }
  0xc5   : > { %2519 = vmatprep.subr.bf16.mxu0 %v2774_v43 }
  0xc6   : > { %2548 = vmatpush3.bf16.msra.mxu1 %v2774_v43 }
  0xc7   : > { %2541 = vmatprep.subr.bf16.mxu1 %v2775_v33 }
  0xc8   : > { %2520 = vmatpush3.bf16.msra.mxu0 %v2774_v43 }
  0xc9   : > { %2521 = vmatprep.subr.bf16.mxu0 %v2775_v33 }
  0xca   : > { %2549 = vmatpush3.bf16.msra.mxu1 %v2775_v33 }
  0xcb   : > { %2542 = vmatprep.subr.bf16.mxu1 %v2776_v49 }
  0xcc   : > { %2522 = vmatpush3.bf16.msra.mxu0 %v2775_v33 }
  0xcd   : > { %2523 = vmatprep.subr.bf16.mxu0 %v2776_v49 }
  0xce   : > { %2550 = vmatpush3.bf16.msra.mxu1 %v2776_v49 }
  0xcf   : > { %2543 = vmatprep.subr.bf16.mxu1 %v2777_v6 }
  0xd0   : > { %2524 = vmatpush3.bf16.msra.mxu0 %v2776_v49 }
  0xd1   : > { %2525 = vmatprep.subr.bf16.mxu0 %v2777_v6 }
  0xd2   : > { %2551 = vmatpush3.bf16.msra.mxu1 %v2777_v6 }
  0xd3   : > { %2544 = vmatprep.subr.bf16.mxu1 %v2778_v25 }
  0xd4   : > { %2526 = vmatpush3.bf16.msra.mxu0 %v2777_v6 }
  0xd5   : > { %2527 = vmatprep.subr.bf16.mxu0 %v2778_v25 }
  0xd6   : > { %2552 = vmatpush3.bf16.msra.mxu1 %v2778_v25 }
  0xd8   : > { %2528 = vmatpush3.bf16.msra.mxu0 %v2778_v25 }
  0xd9   : > { %2534 = vmatmul.mubr.bf16.vlgmr.msra.gmra.mrb[8].mxu1 %v2157_v37 }
  0xdb   : > { %2530 = vmatmul.mubr.bf16.vlgmr.msra.gmra.mrb[0].mxu0 %v3323_v10 }
 0x18c   : > { %v2411_v38 = vpop.f32.mrb[0].mxu1 }
 0x18d   : > { %v990_v46 = vpop.f32.mrb[1].mxu1 }
 0x18e   : > { %v2412_v52 = vpop.f32.mrb[2].mxu1 }
 0x18f   : > { %v993_v63 = vpop.f32.mrb[3].mxu1 }
 0x194   : > { %v2415_v11 = vpop.f32.mrb[4].mxu1 }
 0x195   : > { %v1006_v28 = vpop.f32.mrb[5].mxu1 }
 0x196   : > { %v2416_v47 = vpop.f32.mrb[6].mxu1  ;;  %v2511_v51 = vpop.f32.mrb[4].mxu0 }
 0x197   : > { %v1009_v44 = vpop.f32.mrb[7].mxu1  ;;  %v2557_v15 = vadd.f32 %v2511_v51, %v2415_v11  ;;  %v1612_v19 = vpop.f32.mrb[5].mxu0 }
 0x198   : > { %v2559_v22 = vadd.f32 %v1612_v19, %v1006_v28  ;;  %v2512_v45 = vpop.f32.mrb[6].mxu0 }
 0x199   : > { %v2561_v12 = vadd.f32 %v2512_v45, %v2416_v47  ;;  %v1615_v21 = vpop.f32.mrb[7].mxu0 }
 0x19a   : > { %v2563_v23 = vadd.f32 %v1615_v21, %v1009_v44 }
 0x1ac   : > { %v2535_v37 = vpop.f32.mrb[8].mxu1 }
 0x1ad   : > { %v3360_v57 = vadd.f32 %v2557_v15, %v2535_v37  ;;  %v1757_v55 = vpop.f32.mrb[9].mxu1 }
 0x1ae   : > { %v3363_v56 = vadd.f32 %v2559_v22, %v1757_v55  ;;  %v2536_v58 = vpop.f32.mrb[10].mxu1  ;;  %v2531_v61 = vpop.f32.mrb[0].mxu0 }
 0x1af   : > { %v3365_v59 = vadd.f32 %v2561_v12, %v2536_v58  ;;  %v1760_v60 = vpop.f32.mrb[11].mxu1  ;;  %v2553_v32 = vadd.f32 %v2531_v61, %v2411_v38  ;;  %v1741_v62 = vpop.f32.mrb[1].mxu0 }
 0x1b0   : > { %v2564_v13 = vadd.f32 %v2563_v23, %v1760_v60  ;;  %v2554_v34 = vadd.f32 %v1741_v62, %v990_v46  ;;  %v2532_v48 = vpop.f32.mrb[2].mxu0 }
 0x1b1   : > { %v2208_v29 = vpack.c.bf16 %v3365_v59, %v3360_v57  ;;  %v2555_v53 = vadd.f32 %v2532_v48, %v2412_v52  ;;  %v1744_v54 = vpop.f32.mrb[3].mxu0  ;;  %v1836_v0 = vmul.f32 %v2553_v32, %v2553_v32 }
 0x1b2   : > { %v2203_v36 = vpack.c.bf16 %v2564_v13, %v3363_v56  ;;  %v2556_v2 = vadd.f32 %v1744_v54, %v993_v63  ;;  %v1834_v5 = vmul.f32 %v2554_v34, %v2554_v34 }
 0x1b3   : > { %2212 = vst [vmem:[%s234_s12 + $0x18] sm:$0xff] %v2208_v29   ;;  %v2198_v4 = vpack.c.bf16 %v2555_v53, %v2553_v32 }
 0x1b4   : > { %2211 = vst [vmem:[%s234_s12 + $0x10] sm:$0xff] %v2203_v36   ;;  %v2193_v7 = vpack.c.bf16 %v2556_v2, %v2554_v34  ;;  %v1820_v3 = vadd.f32 %v2556_v2, %v2554_v34  ;;  %v1835_v9 = vmul.f32 %v2556_v2, %v2556_v2 }
 0x1b5   : > { %2210 = vst [vmem:[%s234_s12 + $0x8] sm:$0xff] %v2198_v4  }
 0x1b6   : > { %2194 = vst [vmem:[%s234_s12] sm:$0xff] %v2193_v7   ;;  %v1821_v10 = vadd.f32 %v2553_v32, %v1820_v3  ;;  %v1842_v17 = vadd.f32 %v1835_v9, %v1834_v5 }
 0x1b7   : > { %2820 = shalt.err (!%p2817_p7)
}
 0x1b8   : > { %s2821_s9 = scalar_lea.hbm %s3376_s30, 512  ;;  %s2825_s14 = scalar_lea.hbm %s3505_s2, 1024 }
 0x1b9   : > { %p2822_p9 = scmp.ne.s32.totalorder %s3376_s30, %s2821_s9  ;;  %p2826_p2 = scmp.lt.u32.totalorder %s3376_s30, %s3505_s2 }
 0x1ba   : > { %p2827_p1 = scmp.lt.u32.totalorder %s2825_s14, %s2821_s9  ;;  %p2829_p8 = scmp.lt.u32.totalorder %s2821_s9, %s3376_s30 }
 0x1bb   : > { %p2823_p12 = pnand %p2822_p9, %p3522_p10 }
 0x1bc   : > { %p2828_p4 = por %p2827_p1, %p2826_p2 }
 0x1bd   : > { %p2824_p0 = pneg %p2823_p12 }
 0x1be   : > { %p2830_p11 = por %p2829_p8, %p2828_p4 }
 0x1c0   : > { %p2831_p13 = pnand %p2830_p11, %p2824_p0 }
 0x1c2   : > { %2834 = shalt.err (!%p2831_p13)
}
 0x1c3   : > { %s2955_s29 = smov 64   ;;  %s2956_s5 = smov 4   ;;  %v1837_v41 = vmul.f32 %v2555_v53, %v2555_v53  ;;  %v1843_v50 = vadd.f32 %v1842_v17, %v1836_v0  ;;  %v1822_v26 = vadd.f32 %v2555_v53, %v1821_v10  ;;  %v1838_v8 = vmul.f32 %v3363_v56, %v3363_v56 }
 0x1c4   : > { %2622 = dma.vmem_to_hbm [thread:$0]  (%p3522_p10), %s3371_s13, 512, %s3376_s30, %s1857_s7, %s2955_s29, %s2955_s29, %s2956_s5   ;;  %v1839_v39 = vmul.f32 %v2564_v13, %v2564_v13  ;;  %v1840_v1 = vmul.f32 %v3360_v57, %v3360_v57  ;;  %v1841_v30 = vmul.f32 %v3365_v59, %v3365_v59 }
 0x1c5   : > { %v1823_v24 = vadd.f32 %v3363_v56, %v1822_v26  ;;  %v1844_v18 = vadd.f32 %v1843_v50, %v1837_v41  ;;  %s1861_s13 = sand.u32 1, %s3015_s21   ;;  %s2177_s30 = sshll.u32 %s2941_s18, 4 }
 0x1c6   : > { %s240_s7 = scalar_lea.vmem [#allocation6], %s3358_s10  ;;  %s246_s8 = scalar_lea.vmem [#allocation8], %s3358_s10 }
 0x1c7   : > { %v1824_v27 = vadd.f32 %v2564_v13, %v1823_v24  ;;  %v1845_v20 = vadd.f32 %v1844_v18, %v1838_v8  ;;  %s1896_s6 = sshll.u32 %s240_s7, 4  ;;  %s1910_s9 = sshll.u32 %s246_s8, 4  ;;  %s3422_s6 = int_to_ptr.vmem [resolvable:$true] %s1896_s6  ;;  %s3429_s9 = int_to_ptr.vmem [resolvable:$true] %s1910_s9 }
 0x1c8   : > { %s3420_s14 = scalar_lea.hbm %s3506_s3, %s2177_s30  ;;  %s3427_s24 = scalar_lea.hbm %s3507_s4, %s2177_s30 }
 0x1c9   : > { %v1825_v40 = vadd.f32 %v3360_v57, %v1824_v27  ;;  %v1846_v14 = vadd.f32 %v1845_v20, %v1839_v39  ;;  %s3431_s26 = scalar_lea.sflag [#allocation7], %s1861_s13  ;;  %s2835_s29 = scalar_lea.vmem %s3422_s6, 16 }
 0x1ca   : > { %p2836_p3 = scmp.ne.s32.totalorder %s3422_s6, %s2835_s29  ;;  %s2957_s5 = smov [#allocation6]  }
 0x1cb   : > { %v1826_v35 = vadd.f32 %v3365_v59, %v1825_v40  ;;  %v1847_v31 = vadd.f32 %v1846_v14, %v1840_v1  ;;  %s2839_s11 = sshll.u32 %s2957_s5, 4  ;;  %s2840_s11 = int_to_ptr.vmem [resolvable:$false] %s2839_s11 }
 0x1cc   : > { %p2837_p5 = pnand %p2836_p3, %p3522_p10  ;;  %s2841_s12 = scalar_lea.vmem %s2840_s11, 32 }
 0x1cd   : > { %v1827_v16 = vrot.slane %v1826_v35, 4  ;;  %v1848_v42 = vadd.f32 %v1847_v31, %v1841_v30  ;;  %p2842_p7 = scmp.lt.s32.totalorder %s3422_s6, %s2840_s11  ;;  %p2843_p9 = scmp.lt.s32.totalorder %s2841_s12, %s2835_s29 }
 0x1ce   : > { %p2838_p6 = pneg %p2837_p5 }
 0x1cf   : > { %v1828_v43 = vadd.f32 %v1827_v16, %v1826_v35  ;;  %v1849_v33 = vrot.slane %v1848_v42, 4  ;;  %p2844_p12 = por %p2843_p9, %p2842_p7 }
 0x1d1   : > { %v1829_v49 = vrot.slane %v1828_v43, 2  ;;  %v1850_v6 = vadd.f32 %v1849_v33, %v1848_v42  ;;  %p2845_p0 = pnand %p2844_p12, %p2838_p6 }
 0x1d3   : > { %v1851_v25 = vrot.slane %v1850_v6, 2  ;;  %v1830_v38 = vadd.f32 %v1829_v49, %v1828_v43 }
 0x1d5   : > { %v1831_v46 = vrot.slane %v1830_v38, 1  ;;  %v1852_v52 = vadd.f32 %v1851_v25, %v1850_v6 }
 0x1d7   : > { %v1832_v63 = vadd.f32 %v1831_v46, %v1830_v38  ;;  %v1853_v11 = vrot.slane %v1852_v52, 1 }
 0x1d9   : > { %1833 = vst [vmem:[%s240_s7] sm:$0x1] %v1832_v63  ;;  %v1854_v28 = vadd.f32 %v1853_v11, %v1852_v52 }
 0x1da   : > { %2848 = shalt.err (!%p2845_p0)
}
 0x1db   : > { %s2849_s13 = scalar_lea.hbm %s3420_s14, 16  ;;  %s2853_s18 = scalar_lea.hbm %s3506_s3, 32 }
 0x1dc   : > { %p2850_p2 = scmp.ne.s32.totalorder %s3420_s14, %s2849_s13  ;;  %p2854_p8 = scmp.lt.u32.totalorder %s3420_s14, %s3506_s3 }
 0x1dd   : > { %p2855_p11 = scmp.lt.u32.totalorder %s2853_s18, %s2849_s13  ;;  %p2857_p3 = scmp.lt.u32.totalorder %s2849_s13, %s3420_s14 }
 0x1de   : > { %p2851_p1 = pnand %p2850_p2, %p3522_p10 }
 0x1df   : > { %p2856_p13 = por %p2855_p11, %p2854_p8 }
 0x1e0   : > { %p2852_p4 = pneg %p2851_p1 }
 0x1e1   : > { %p2858_p5 = por %p2857_p3, %p2856_p13 }
 0x1e3   : > { %p2859_p6 = pnand %p2858_p5, %p2852_p4 }
 0x1e5   : > { %2862 = shalt.err (!%p2859_p6)
}
 0x1e6   : > { %2623 = dma.vmem_to_hbm [thread:$0]  (%p3522_p10), %s3422_s6, 16, %s3420_s14, %s3431_s26   ;;  %1855 = vst [vmem:[%s246_s8] sm:$0x1] %v1854_v28 }
 0x1e7   : > { %s2863_s29 = scalar_lea.vmem %s3429_s9, 16  ;;  %s2958_s11 = smov [#allocation8]  }
 0x1e8   : > { %p2864_p7 = scmp.ne.s32.totalorder %s3429_s9, %s2863_s29  ;;  %s2867_s12 = sshll.u32 %s2958_s11, 4  ;;  %s2868_s12 = int_to_ptr.vmem [resolvable:$false] %s2867_s12 }
 0x1e9   : > { %s2869_s13 = scalar_lea.vmem %s2868_s12, 32  ;;  %p2870_p0 = scmp.lt.s32.totalorder %s3429_s9, %s2868_s12 }
 0x1ea   : > { %p2865_p9 = pnand %p2864_p7, %p3522_p10  ;;  %p2871_p2 = scmp.lt.s32.totalorder %s2869_s13, %s2863_s29 }
 0x1ec   : > { %p2866_p12 = pneg %p2865_p9  ;;  %p2872_p1 = por %p2871_p2, %p2870_p0 }
 0x1ee   : > { %p2873_p4 = pnand %p2872_p1, %p2866_p12 }
 0x1f0   : > { %2876 = shalt.err (!%p2873_p4)
}
 0x1f1   : > { %s2877_s10 = scalar_lea.hbm %s3427_s24, 16  ;;  %s2881_s14 = scalar_lea.hbm %s3507_s4, 32 }
 0x1f2   : > { %p2878_p8 = scmp.ne.s32.totalorder %s3427_s24, %s2877_s10  ;;  %p2882_p3 = scmp.lt.u32.totalorder %s3427_s24, %s3507_s4 }
 0x1f3   : > { %p2883_p5 = scmp.lt.u32.totalorder %s2881_s14, %s2877_s10  ;;  %p2885_p7 = scmp.lt.u32.totalorder %s2877_s10, %s3427_s24 }
 0x1f4   : > { %p2879_p11 = pnand %p2878_p8, %p3522_p10 }
 0x1f5   : > { %p2884_p6 = por %p2883_p5, %p2882_p3 }
 0x1f6   : > { %p2880_p13 = pneg %p2879_p11 }
 0x1f7   : > { %p2886_p9 = por %p2885_p7, %p2884_p6 }
 0x1f9   : > { %p2887_p12 = pnand %p2886_p9, %p2880_p13 }
 0x1fb   : > { %2890 = shalt.err (!%p2887_p12)
}
 0x1fc   : > { %2624 = dma.vmem_to_hbm [thread:$0]  (%p3522_p10), %s3429_s9, 16, %s3427_s24, %s3431_s26  }
 0x1fd PF: > { %p2644_p0 = scmp.ge.s32.totalorder %s2949_s20, 2  ;;  %s1922_s18 = sand.u32 1, %s2929_s15  }
 0x1fe   : > { %p3523_p2 = scmp.ne.s32.totalorder %s3512_s27, 0  ;;  %s1923_s21 = scalar_lea.sflag [#allocation4], %s1922_s18 }
 0x200   : > { %p2633_p1 = pnand %p2644_p0, %p3523_p2 }
 0x202   : > { %2920 = dma.done.wait (!%p2633_p1), %s1923_s21, 512  }
 0x203   : > { %2922 = vsyncadd (!%p2633_p1), %s1923_s21, 4294966784  ;;  %s1931_s5 = sand.u32 1, %s2049_s22  }
 0x204   : > { %s1932_s29 = scalar_lea.sflag [#allocation7], %s1931_s5 }
 0x205   : > { %2924 = dma.done.wait (!%p2633_p1), %s1932_s29, 32  }
 0x206   : > { %2926 = vsyncadd (!%p2633_p1), %s1932_s29, 4294967264  ;;  %s22_s20 = sadd.s32 1, %s2949_s20   ;;  %s3524_s15 = smov %s2933_s16 }
 0x207   : > { %p19_p10 = scmp.ge.s32.totalorder %s22_s20, 4   ;;  %s3525_s16 = smov %s2937_s17 }
 0x208   : > { %s3526_s17 = smov %s3042_s28  ;;  %s3527_s18 = smov %s2945_s19 }
 0x209   : > { %s3528_s19 = smov %s3530_s23  ;;  %21 = sbr.rel (!%p19_p10) target bundleno = 7 (0x7), region = 101 }
 0x210   :  { %1944 = vsyncpa [#allocation3], 1 }
 0x211   :  { %1946 = vsyncpa [#allocation3 + $0x1], 1 }
 0x212   :  { %1947 = vsyncpa [#allocation4], 1 }
 0x213   :  { %1949 = vsyncpa [#allocation4 + $0x1], 1 }
 0x214   :  { %1950 = vsyncpa [#allocation7], 1 }
 0x215   :  { %1952 = vsyncpa [#allocation7 + $0x1], 1 }

</bundles_post_ra>
